<compile_context>
chip_gen: v7x
topology: tpu7x:2x2x1
jax: 0.10.0
libtpu: 0.0.40
codegen_flags: <defaults>
</compile_context>

<pallas_src>
import jax
import jax.numpy as jnp
from jax.experimental import pallas as pl
from jax.experimental.pallas import tpu as pltpu

_LANE = 128
_SUBLANE = 8


# --------------------------------------------------------------------------
# Fused forward kernel (single invocation, everything VMEM-resident)
# --------------------------------------------------------------------------
def _make_fused_kernel(seq_len, batch, hidden, num_layers):
    """batch here is the sublane-padded batch (multiple of 8)."""
    H = hidden
    n_layer_args = 3 + 2 * (num_layers - 1)   # layer0: wih,whh,b ; l>=1: wfused,b

    def kernel(x_ref, vec_ref, fcx_ref, fcv_ref, fcb_ref, *rest):
        layer_refs = rest[:n_layer_args]
        post_w_ref = rest[n_layer_args + 0]
        post_b_ref = rest[n_layer_args + 1]
        o_ref = rest[n_layer_args + 2]
        xg_ref = rest[n_layer_args + 3]     # (T*B, 4H) f32 scratch
        seq_ref = rest[n_layer_args + 4]    # (T*B, H)  f32 scratch (last layer h)

        f32 = jnp.float32
        bf16 = jnp.bfloat16

        # ---- fully_connected + LeakyReLU(0.2) --------------------------------
        # concat(x, vector) @ W == x @ W_x + vector @ W_v ; vector projected once
        # and broadcast-added over time (no seq_len-way concatenate).
        x_proj = jnp.dot(x_ref[...], fcx_ref[...],
                         preferred_element_type=f32)                 # (T*B, H)
        v_bias = jnp.dot(vec_ref[...], fcv_ref[...],
                         preferred_element_type=f32) + fcb_ref[...]  # (B, H)
        y = x_proj.reshape(seq_len, batch, H) + v_bias[None, :, :]   # broadcast add
        y = jnp.maximum(y, 0.2 * y).reshape(seq_len * batch, H)      # LeakyReLU(0.2)

        # ---- layer-0 hoisted input projection -> VMEM scratch ----------------
        # (i/f/o gate columns of wih0/whh0/b0 carry the 0.5 pre-scale.)
        wih0 = layer_refs[0][...]        # (H, 4H)  bf16
        whh0 = layer_refs[1][...]        # (H, 4H)  bf16
        b0 = layer_refs[2][...]          # (1, 4H)  f32
        xg_ref[...] = jnp.dot(y.astype(bf16), wih0,
                              preferred_element_type=f32) + b0       # (T*B, 4H)

        # fused [Wih;Whh] weights / biases for layers >= 1 (loaded once).
        w_fused = [layer_refs[3 + 2 * (l - 1)][...] for l in range(1, num_layers)]
        b_upper = [layer_refs[4 + 2 * (l - 1)][...] for l in range(1, num_layers)]

        def lstm_step(gates, c):
            # Single full-vreg tanh; i/f/o recovered as sigmoid(z)=0.5*(1+tanh(z/2))
            # because their weight/bias columns were pre-scaled by 0.5.
            t = jnp.tanh(gates)                                       # (B, 4H) EUP
            i_g = 0.5 + 0.5 * t[:, 0 * H:1 * H]
            f_g = 0.5 + 0.5 * t[:, 1 * H:2 * H]
            g_g = t[:, 2 * H:3 * H]
            o_g = 0.5 + 0.5 * t[:, 3 * H:4 * H]
            c_new = f_g * c + i_g * g_g
            h_new = o_g * jnp.tanh(c_new)
            return h_new, c_new

        zeros = jnp.zeros((batch, H), f32)
        h = [zeros] * num_layers
        c = [zeros] * num_layers

        # ---- wavefront recurrence: superstep s runs layer l at time t = s-l ---
        # Layers inside a superstep are mutually independent (each consumes only
        # state snapshotted from the previous superstep), so their MXU/EUP/VPU
        # chains overlap.  Fully unrolled (T=8 is small); switch to
        # lax.fori_loop(..., unroll=k) if seq_len grows beyond ~16.
        for s in range(seq_len + num_layers - 1):
            h_prev = list(h)   # snapshot of previous-superstep state
            for l in range(num_layers):
                t_idx = s - l
                if not (0 <= t_idx < seq_len):
                    continue
                if l == 0:
                    gates = xg_ref[t_idx * batch:(t_idx + 1) * batch, :] + jnp.dot(
                        h_prev[0].astype(bf16), whh0,
                        preferred_element_type=f32)                   # (B, 4H)
                else:
                    # one MXU push: [h_{l-1,t} ; h_{l,t-1}] @ [Wih_l ; Whh_l]
                    lhs = jnp.concatenate([h_prev[l - 1], h_prev[l]], axis=1)
                    gates = jnp.dot(lhs.astype(bf16), w_fused[l - 1],
                                    preferred_element_type=f32) + b_upper[l - 1]
                h[l], c[l] = lstm_step(gates, c[l])
                if l == num_layers - 1:
                    seq_ref[t_idx * batch:(t_idx + 1) * batch, :] = h[l]

        # ---- post_linear + Tanh (lane-dense padded output) -------------------
        out = jnp.dot(seq_ref[...].astype(bf16), post_w_ref[...],
                      preferred_element_type=f32) + post_b_ref[...]
        o_ref[...] = jnp.tanh(out)

    return kernel


# --------------------------------------------------------------------------
# Parameter init (deterministic, PyTorch-style uniform(-1/sqrt(fan), 1/sqrt(fan)))
# --------------------------------------------------------------------------
def init_params(key, channel_noise, embed_size, hidden_size, output_size, num_layers):
    def uni(k, shape, fan_in):
        bound = 1.0 / jnp.sqrt(jnp.float32(fan_in))
        return jax.random.uniform(k, shape, jnp.float32, -bound, bound)

    keys = jax.random.split(key, 4 + 4 * num_layers)
    d_in = channel_noise + embed_size

    fc_w_t = uni(keys[0], (d_in, hidden_size), d_in)  # stored transposed: (d_in, H)
    params = {
        # fully_connected weight split so concat(x, vector) never materializes
        "fc_wx_t": fc_w_t[:channel_noise],            # (c_noise, H)
        "fc_wv_t": fc_w_t[channel_noise:],            # (embed,  H)
        "fc_b": uni(keys[1], (1, hidden_size), d_in),
        # post_linear: Linear(hidden, output)
        "post_w_t": uni(keys[2], (hidden_size, output_size), hidden_size),
        "post_b": uni(keys[3], (1, output_size), hidden_size),
        "lstm": [],
    }
    for layer in range(num_layers):
        in_sz = hidden_size  # layer 0 input is hidden_size (after fc)
        kk = keys[4 + 4 * layer: 8 + 4 * layer]
        wih = uni(kk[0], (4 * hidden_size, in_sz), hidden_size)
        whh = uni(kk[1], (4 * hidden_size, hidden_size), hidden_size)
        bih = uni(kk[2], (4 * hidden_size,), hidden_size)
        bhh = uni(kk[3], (4 * hidden_size,), hidden_size)
        params["lstm"].append({
            "wih_t": wih.T,                 # (in, 4H)   gate order i,f,g,o
            "whh_t": whh.T,                 # (H, 4H)
            "bias": (bih + bhh)[None, :],   # (1, 4H)
        })
    return params


# --------------------------------------------------------------------------
# Forward pass (matches LSTM_Generator.forward, eval mode)
# --------------------------------------------------------------------------
@jax.jit
def lstm_generator_forward(params, x, lens, vector):
    del lens  # unused in the reference forward
    batch, seq_len, c_noise = x.shape
    hidden = params["fc_wx_t"].shape[1]
    out_size = params["post_w_t"].shape[1]
    num_layers = len(params["lstm"])

    b_pad = max(_SUBLANE, ((batch + _SUBLANE - 1) // _SUBLANE) * _SUBLANE)
    out_pad = max(_LANE, ((out_size + _LANE - 1) // _LANE) * _LANE)

    # pad batch to a full sublane group; time-major flatten (rows grouped by t)
    x_p = jnp.pad(x, ((0, b_pad - batch), (0, 0), (0, 0)))
    vec_p = jnp.pad(vector, ((0, b_pad - batch), (0, 0)))
    x_tm = jnp.transpose(x_p, (1, 0, 2)).reshape(seq_len * b_pad, c_noise)

    # lane-dense post-linear weights (tanh(0) == 0 in padded lanes, sliced away)
    post_w = jnp.pad(params["post_w_t"], ((0, 0), (0, out_pad - out_size)))
    post_b = jnp.pad(params["post_b"], ((0, 0), (0, out_pad - out_size)))

    # sigmoid-via-tanh: pre-scale the i/f/o gate columns (PyTorch order i,f,g,o)
    # by 0.5 so the kernel needs only one full-vreg tanh per step.  Exact in bf16.
    gate_scale = jnp.concatenate([
        jnp.full((hidden,), 0.5, jnp.float32),
        jnp.full((hidden,), 0.5, jnp.float32),
        jnp.ones((hidden,), jnp.float32),
        jnp.full((hidden,), 0.5, jnp.float32)])

    layer_args = []
    for li, lp in enumerate(params["lstm"]):
        wih = (lp["wih_t"] * gate_scale).astype(jnp.bfloat16)
        whh = (lp["whh_t"] * gate_scale).astype(jnp.bfloat16)
        bias = lp["bias"] * gate_scale
        if li == 0:
            layer_args += [wih, whh, bias]
        else:
            # fused [Wih ; Whh] -> one MXU push per step for this layer
            layer_args += [jnp.concatenate([wih, whh], axis=0), bias]

    kernel = _make_fused_kernel(seq_len, b_pad, hidden, num_layers)
    out_flat = pl.pallas_call(
        kernel,
        out_shape=jax.ShapeDtypeStruct((seq_len * b_pad, out_pad), jnp.float32),
        scratch_shapes=[
            pltpu.VMEM((seq_len * b_pad, 4 * hidden), jnp.float32),  # hoisted xg
            pltpu.VMEM((seq_len * b_pad, hidden), jnp.float32),      # last-layer h
        ],
    )(x_tm, vec_p, params["fc_wx_t"], params["fc_wv_t"], params["fc_b"],
      *layer_args, post_w.astype(jnp.bfloat16), post_b)

    out = out_flat.reshape(seq_len, b_pad, out_pad)
    return out[:, :batch, :out_size].transpose(1, 0, 2)  # (B, T, out_size)


# --------------------------------------------------------------------------
if __name__ == "__main__":
    BATCH = 2
    SEQ = 8
    CHANNEL_NOISE = 12
    EMBED = 20
    HIDDEN = 32
    OUT = 8
    NUM_LAYERS = 2

    key = jax.random.PRNGKey(0)
    k_par, k_x, k_v = jax.random.split(key, 3)

    params = init_params(k_par, CHANNEL_NOISE, EMBED, HIDDEN, OUT, NUM_LAYERS)

    x = jax.random.normal(k_x, (BATCH, SEQ, CHANNEL_NOISE), jnp.float32)
    vector = jax.random.normal(k_v, (BATCH, EMBED), jnp.float32)
    lens = jnp.full((BATCH,), SEQ, jnp.int32)

    out = lstm_generator_forward(params, x, lens, vector)
    out = jax.block_until_ready(out)

    assert out.shape == (BATCH, SEQ, OUT)
    assert bool(jnp.all(jnp.isfinite(out)))
    assert bool(jnp.all(jnp.abs(out) <= 1.0))  # tanh output range
    print("KERNEL_OK")
</pallas_src>

<mosaic_0001>
module attributes {stable_mosaic.version = 11 : i64} {
  func.func @kernel(%arg0: memref<64x12xf32, #tpu.memory_space<vmem>>, %arg1: memref<8x20xf32, #tpu.memory_space<vmem>>, %arg2: memref<12x32xf32, #tpu.memory_space<vmem>>, %arg3: memref<20x32xf32, #tpu.memory_space<vmem>>, %arg4: memref<1x32xf32, #tpu.memory_space<vmem>>, %arg5: memref<32x128xbf16, #tpu.memory_space<vmem>>, %arg6: memref<32x128xbf16, #tpu.memory_space<vmem>>, %arg7: memref<1x128xf32, #tpu.memory_space<vmem>>, %arg8: memref<64x128xbf16, #tpu.memory_space<vmem>>, %arg9: memref<1x128xf32, #tpu.memory_space<vmem>>, %arg10: memref<32x128xbf16, #tpu.memory_space<vmem>>, %arg11: memref<1x128xf32, #tpu.memory_space<vmem>>, %arg12: memref<64x128xf32, #tpu.memory_space<vmem>>, %arg13: memref<64x128xf32, #tpu.memory_space<vmem>>, %arg14: memref<64x32xf32, #tpu.memory_space<vmem>>) attributes {dimension_semantics = [], scalar_prefetch = 0 : i64, scratch_operands = 2 : i64, tpu.core_type = #tpu.core_type<tc>} {
    %c0 = arith.constant 0 : index
    %c0_0 = arith.constant 0 : index
    %0 = vector.load %arg0[%c0, %c0_0] : memref<64x12xf32, #tpu.memory_space<vmem>>, vector<64x12xf32>
    %c0_1 = arith.constant 0 : index
    %c0_2 = arith.constant 0 : index
    %1 = vector.load %arg2[%c0_1, %c0_2] : memref<12x32xf32, #tpu.memory_space<vmem>>, vector<12x32xf32>
    %cst = arith.constant dense<0.000000e+00> : vector<64x32xf32>
    %2 = tpu.matmul %0, %1, %cst {dimension_numbers = #tpu.dot_dimension_numbers<[1], [0], [0], [1], [0, 0, 1, 1], [], []>} : vector<64x12xf32>, vector<12x32xf32>, vector<64x32xf32> -> vector<64x32xf32>
    %c0_3 = arith.constant 0 : index
    %c0_4 = arith.constant 0 : index
    %3 = vector.load %arg1[%c0_3, %c0_4] : memref<8x20xf32, #tpu.memory_space<vmem>>, vector<8x20xf32>
    %c0_5 = arith.constant 0 : index
    %c0_6 = arith.constant 0 : index
    %4 = vector.load %arg3[%c0_5, %c0_6] : memref<20x32xf32, #tpu.memory_space<vmem>>, vector<20x32xf32>
    %cst_7 = arith.constant dense<0.000000e+00> : vector<8x32xf32>
    %5 = tpu.matmul %3, %4, %cst_7 {dimension_numbers = #tpu.dot_dimension_numbers<[1], [0], [0], [1], [0, 0, 1, 1], [], []>} : vector<8x20xf32>, vector<20x32xf32>, vector<8x32xf32> -> vector<8x32xf32>
    %c0_8 = arith.constant 0 : index
    %c0_9 = arith.constant 0 : index
    %6 = vector.load %arg4[%c0_8, %c0_9] : memref<1x32xf32, #tpu.memory_space<vmem>>, vector<1x32xf32>
    %7 = vector.broadcast %6 : vector<1x32xf32> to vector<8x32xf32>
    %8 = arith.addf %5, %7 : vector<8x32xf32>
    %9 = vector.shape_cast %2 : vector<64x32xf32> to vector<8x8x32xf32>
    %10 = vector.shape_cast %8 : vector<8x32xf32> to vector<1x8x32xf32>
    %11 = vector.broadcast %10 : vector<1x8x32xf32> to vector<8x8x32xf32>
    %12 = arith.addf %9, %11 : vector<8x8x32xf32>
    %cst_10 = arith.constant 2.000000e-01 : f32
    %13 = vector.broadcast %cst_10 : f32 to vector<8x8x32xf32>
    %14 = arith.mulf %13, %12 : vector<8x8x32xf32>
    %15 = arith.maximumf %12, %14 : vector<8x8x32xf32>
    %16 = vector.shape_cast %15 : vector<8x8x32xf32> to vector<64x32xf32>
    %c0_11 = arith.constant 0 : index
    %c0_12 = arith.constant 0 : index
    %17 = vector.load %arg5[%c0_11, %c0_12] : memref<32x128xbf16, #tpu.memory_space<vmem>>, vector<32x128xbf16>
    %c0_13 = arith.constant 0 : index
    %c0_14 = arith.constant 0 : index
    %18 = vector.load %arg6[%c0_13, %c0_14] : memref<32x128xbf16, #tpu.memory_space<vmem>>, vector<32x128xbf16>
    %c0_15 = arith.constant 0 : index
    %c0_16 = arith.constant 0 : index
    %19 = vector.load %arg7[%c0_15, %c0_16] : memref<1x128xf32, #tpu.memory_space<vmem>>, vector<1x128xf32>
    %20 = arith.truncf %16 : vector<64x32xf32> to vector<64x32xbf16>
    %cst_17 = arith.constant dense<0.000000e+00> : vector<64x128xf32>
    %21 = tpu.matmul %20, %17, %cst_17 {dimension_numbers = #tpu.dot_dimension_numbers<[1], [0], [0], [1], [0, 0, 1, 1], [], []>} : vector<64x32xbf16>, vector<32x128xbf16>, vector<64x128xf32> -> vector<64x128xf32>
    %22 = vector.broadcast %19 : vector<1x128xf32> to vector<64x128xf32>
    %23 = arith.addf %21, %22 : vector<64x128xf32>
    %c0_18 = arith.constant 0 : index
    %c0_19 = arith.constant 0 : index
    %24 = vector.load %arg13[%c0_18, %c0_19] : memref<64x128xf32, #tpu.memory_space<vmem>>, vector<64x128xf32>
    tpu.vector_store %arg13[%c0_18, %c0_19], %23 {strides = array<i32>} : memref<64x128xf32, #tpu.memory_space<vmem>>, vector<64x128xf32>,
    %c0_20 = arith.constant 0 : index
    %c0_21 = arith.constant 0 : index
    %25 = vector.load %arg8[%c0_20, %c0_21] : memref<64x128xbf16, #tpu.memory_space<vmem>>, vector<64x128xbf16>
    %c0_22 = arith.constant 0 : index
    %c0_23 = arith.constant 0 : index
    %26 = vector.load %arg9[%c0_22, %c0_23] : memref<1x128xf32, #tpu.memory_space<vmem>>, vector<1x128xf32>
    %cst_24 = arith.constant 0.000000e+00 : f32
    %27 = vector.broadcast %cst_24 : f32 to vector<8x32xf32>
    %c0_25 = arith.constant 0 : index
    %c0_26 = arith.constant 0 : index
    %28 = vector.load %arg13[%c0_25, %c0_26] : memref<64x128xf32, #tpu.memory_space<vmem>>, vector<8x128xf32>
    %29 = arith.truncf %27 : vector<8x32xf32> to vector<8x32xbf16>
    %cst_27 = arith.constant dense<0.000000e+00> : vector<8x128xf32>
    %30 = tpu.matmul %29, %18, %cst_27 {dimension_numbers = #tpu.dot_dimension_numbers<[1], [0], [0], [1], [0, 0, 1, 1], [], []>} : vector<8x32xbf16>, vector<32x128xbf16>, vector<8x128xf32> -> vector<8x128xf32>
    %31 = arith.addf %28, %30 : vector<8x128xf32>
    %32 = math.tanh %31 : vector<8x128xf32>
    %33 = vector.extract_strided_slice %32 {offsets = [0, 0], sizes = [8, 32], strides = [1, 1]} : vector<8x128xf32> to vector<8x32xf32>
    %cst_28 = arith.constant 5.000000e-01 : f32
    %34 = vector.broadcast %cst_28 : f32 to vector<8x32xf32>
    %35 = arith.mulf %34, %33 : vector<8x32xf32>
    %cst_29 = arith.constant 5.000000e-01 : f32
    %36 = vector.broadcast %cst_29 : f32 to vector<8x32xf32>
    %37 = arith.addf %36, %35 : vector<8x32xf32>
    %38 = vector.extract_strided_slice %32 {offsets = [0, 32], sizes = [8, 32], strides = [1, 1]} : vector<8x128xf32> to vector<8x32xf32>
    %cst_30 = arith.constant 5.000000e-01 : f32
    %39 = vector.broadcast %cst_30 : f32 to vector<8x32xf32>
    %40 = arith.mulf %39, %38 : vector<8x32xf32>
    %cst_31 = arith.constant 5.000000e-01 : f32
    %41 = vector.broadcast %cst_31 : f32 to vector<8x32xf32>
    %42 = arith.addf %41, %40 : vector<8x32xf32>
    %43 = vector.extract_strided_slice %32 {offsets = [0, 64], sizes = [8, 32], strides = [1, 1]} : vector<8x128xf32> to vector<8x32xf32>
    %44 = vector.extract_strided_slice %32 {offsets = [0, 96], sizes = [8, 32], strides = [1, 1]} : vector<8x128xf32> to vector<8x32xf32>
    %cst_32 = arith.constant 5.000000e-01 : f32
    %45 = vector.broadcast %cst_32 : f32 to vector<8x32xf32>
    %46 = arith.mulf %45, %44 : vector<8x32xf32>
    %cst_33 = arith.constant 5.000000e-01 : f32
    %47 = vector.broadcast %cst_33 : f32 to vector<8x32xf32>
    %48 = arith.addf %47, %46 : vector<8x32xf32>
    %49 = arith.mulf %42, %27 : vector<8x32xf32>
    %50 = arith.mulf %37, %43 : vector<8x32xf32>
    %51 = arith.addf %49, %50 : vector<8x32xf32>
    %52 = math.tanh %51 : vector<8x32xf32>
    %53 = arith.mulf %48, %52 : vector<8x32xf32>
    %c8 = arith.constant 8 : index
    %c0_34 = arith.constant 0 : index
    %54 = vector.load %arg13[%c8, %c0_34] : memref<64x128xf32, #tpu.memory_space<vmem>>, vector<8x128xf32>
    %55 = arith.truncf %53 : vector<8x32xf32> to vector<8x32xbf16>
    %cst_35 = arith.constant dense<0.000000e+00> : vector<8x128xf32>
    %56 = tpu.matmul %55, %18, %cst_35 {dimension_numbers = #tpu.dot_dimension_numbers<[1], [0], [0], [1], [0, 0, 1, 1], [], []>} : vector<8x32xbf16>, vector<32x128xbf16>, vector<8x128xf32> -> vector<8x128xf32>
    %57 = arith.addf %54, %56 : vector<8x128xf32>
    %58 = math.tanh %57 : vector<8x128xf32>
    %59 = vector.extract_strided_slice %58 {offsets = [0, 0], sizes = [8, 32], strides = [1, 1]} : vector<8x128xf32> to vector<8x32xf32>
    %cst_36 = arith.constant 5.000000e-01 : f32
    %60 = vector.broadcast %cst_36 : f32 to vector<8x32xf32>
    %61 = arith.mulf %60, %59 : vector<8x32xf32>
    %cst_37 = arith.constant 5.000000e-01 : f32
    %62 = vector.broadcast %cst_37 : f32 to vector<8x32xf32>
    %63 = arith.addf %62, %61 : vector<8x32xf32>
    %64 = vector.extract_strided_slice %58 {offsets = [0, 32], sizes = [8, 32], strides = [1, 1]} : vector<8x128xf32> to vector<8x32xf32>
    %cst_38 = arith.constant 5.000000e-01 : f32
    %65 = vector.broadcast %cst_38 : f32 to vector<8x32xf32>
    %66 = arith.mulf %65, %64 : vector<8x32xf32>
    %cst_39 = arith.constant 5.000000e-01 : f32
    %67 = vector.broadcast %cst_39 : f32 to vector<8x32xf32>
    %68 = arith.addf %67, %66 : vector<8x32xf32>
    %69 = vector.extract_strided_slice %58 {offsets = [0, 64], sizes = [8, 32], strides = [1, 1]} : vector<8x128xf32> to vector<8x32xf32>
    %70 = vector.extract_strided_slice %58 {offsets = [0, 96], sizes = [8, 32], strides = [1, 1]} : vector<8x128xf32> to vector<8x32xf32>
    %cst_40 = arith.constant 5.000000e-01 : f32
    %71 = vector.broadcast %cst_40 : f32 to vector<8x32xf32>
    %72 = arith.mulf %71, %70 : vector<8x32xf32>
    %cst_41 = arith.constant 5.000000e-01 : f32
    %73 = vector.broadcast %cst_41 : f32 to vector<8x32xf32>
    %74 = arith.addf %73, %72 : vector<8x32xf32>
    %75 = arith.mulf %68, %51 : vector<8x32xf32>
    %76 = arith.mulf %63, %69 : vector<8x32xf32>
    %77 = arith.addf %75, %76 : vector<8x32xf32>
    %78 = math.tanh %77 : vector<8x32xf32>
    %79 = arith.mulf %74, %78 : vector<8x32xf32>
    %80 = tpu.concatenate %53, %27 in 1 : vector<8x32xf32>, vector<8x32xf32> -> vector<8x64xf32>
    %81 = arith.truncf %80 : vector<8x64xf32> to vector<8x64xbf16>
    %cst_42 = arith.constant dense<0.000000e+00> : vector<8x128xf32>
    %82 = tpu.matmul %81, %25, %cst_42 {dimension_numbers = #tpu.dot_dimension_numbers<[1], [0], [0], [1], [0, 0, 1, 1], [], []>} : vector<8x64xbf16>, vector<64x128xbf16>, vector<8x128xf32> -> vector<8x128xf32>
    %83 = vector.broadcast %26 : vector<1x128xf32> to vector<8x128xf32>
    %84 = arith.addf %82, %83 : vector<8x128xf32>
    %85 = math.tanh %84 : vector<8x128xf32>
    %86 = vector.extract_strided_slice %85 {offsets = [0, 0], sizes = [8, 32], strides = [1, 1]} : vector<8x128xf32> to vector<8x32xf32>
    %cst_43 = arith.constant 5.000000e-01 : f32
    %87 = vector.broadcast %cst_43 : f32 to vector<8x32xf32>
    %88 = arith.mulf %87, %86 : vector<8x32xf32>
    %cst_44 = arith.constant 5.000000e-01 : f32
    %89 = vector.broadcast %cst_44 : f32 to vector<8x32xf32>
    %90 = arith.addf %89, %88 : vector<8x32xf32>
    %91 = vector.extract_strided_slice %85 {offsets = [0, 32], sizes = [8, 32], strides = [1, 1]} : vector<8x128xf32> to vector<8x32xf32>
    %cst_45 = arith.constant 5.000000e-01 : f32
    %92 = vector.broadcast %cst_45 : f32 to vector<8x32xf32>
    %93 = arith.mulf %92, %91 : vector<8x32xf32>
    %cst_46 = arith.constant 5.000000e-01 : f32
    %94 = vector.broadcast %cst_46 : f32 to vector<8x32xf32>
    %95 = arith.addf %94, %93 : vector<8x32xf32>
    %96 = vector.extract_strided_slice %85 {offsets = [0, 64], sizes = [8, 32], strides = [1, 1]} : vector<8x128xf32> to vector<8x32xf32>
    %97 = vector.extract_strided_slice %85 {offsets = [0, 96], sizes = [8, 32], strides = [1, 1]} : vector<8x128xf32> to vector<8x32xf32>
    %cst_47 = arith.constant 5.000000e-01 : f32
    %98 = vector.broadcast %cst_47 : f32 to vector<8x32xf32>
    %99 = arith.mulf %98, %97 : vector<8x32xf32>
    %cst_48 = arith.constant 5.000000e-01 : f32
    %100 = vector.broadcast %cst_48 : f32 to vector<8x32xf32>
    %101 = arith.addf %100, %99 : vector<8x32xf32>
    %102 = arith.mulf %95, %27 : vector<8x32xf32>
    %103 = arith.mulf %90, %96 : vector<8x32xf32>
    %104 = arith.addf %102, %103 : vector<8x32xf32>
    %105 = math.tanh %104 : vector<8x32xf32>
    %106 = arith.mulf %101, %105 : vector<8x32xf32>
    %c0_49 = arith.constant 0 : index
    %c0_50 = arith.constant 0 : index
    %107 = vector.load %arg14[%c0_49, %c0_50] : memref<64x32xf32, #tpu.memory_space<vmem>>, vector<8x32xf32>
    tpu.vector_store %arg14[%c0_49, %c0_50], %106 {strides = array<i32>} : memref<64x32xf32, #tpu.memory_space<vmem>>, vector<8x32xf32>,
    %c16 = arith.constant 16 : index
    %c0_51 = arith.constant 0 : index
    %108 = vector.load %arg13[%c16, %c0_51] : memref<64x128xf32, #tpu.memory_space<vmem>>, vector<8x128xf32>
    %109 = arith.truncf %79 : vector<8x32xf32> to vector<8x32xbf16>
    %cst_52 = arith.constant dense<0.000000e+00> : vector<8x128xf32>
    %110 = tpu.matmul %109, %18, %cst_52 {dimension_numbers = #tpu.dot_dimension_numbers<[1], [0], [0], [1], [0, 0, 1, 1], [], []>} : vector<8x32xbf16>, vector<32x128xbf16>, vector<8x128xf32> -> vector<8x128xf32>
    %111 = arith.addf %108, %110 : vector<8x128xf32>
    %112 = math.tanh %111 : vector<8x128xf32>
    %113 = vector.extract_strided_slice %112 {offsets = [0, 0], sizes = [8, 32], strides = [1, 1]} : vector<8x128xf32> to vector<8x32xf32>
    %cst_53 = arith.constant 5.000000e-01 : f32
    %114 = vector.broadcast %cst_53 : f32 to vector<8x32xf32>
    %115 = arith.mulf %114, %113 : vector<8x32xf32>
    %cst_54 = arith.constant 5.000000e-01 : f32
    %116 = vector.broadcast %cst_54 : f32 to vector<8x32xf32>
    %117 = arith.addf %116, %115 : vector<8x32xf32>
    %118 = vector.extract_strided_slice %112 {offsets = [0, 32], sizes = [8, 32], strides = [1, 1]} : vector<8x128xf32> to vector<8x32xf32>
    %cst_55 = arith.constant 5.000000e-01 : f32
    %119 = vector.broadcast %cst_55 : f32 to vector<8x32xf32>
    %120 = arith.mulf %119, %118 : vector<8x32xf32>
    %cst_56 = arith.constant 5.000000e-01 : f32
    %121 = vector.broadcast %cst_56 : f32 to vector<8x32xf32>
    %122 = arith.addf %121, %120 : vector<8x32xf32>
    %123 = vector.extract_strided_slice %112 {offsets = [0, 64], sizes = [8, 32], strides = [1, 1]} : vector<8x128xf32> to vector<8x32xf32>
    %124 = vector.extract_strided_slice %112 {offsets = [0, 96], sizes = [8, 32], strides = [1, 1]} : vector<8x128xf32> to vector<8x32xf32>
    %cst_57 = arith.constant 5.000000e-01 : f32
    %125 = vector.broadcast %cst_57 : f32 to vector<8x32xf32>
    %126 = arith.mulf %125, %124 : vector<8x32xf32>
    %cst_58 = arith.constant 5.000000e-01 : f32
    %127 = vector.broadcast %cst_58 : f32 to vector<8x32xf32>
    %128 = arith.addf %127, %126 : vector<8x32xf32>
    %129 = arith.mulf %122, %77 : vector<8x32xf32>
    %130 = arith.mulf %117, %123 : vector<8x32xf32>
    %131 = arith.addf %129, %130 : vector<8x32xf32>
    %132 = math.tanh %131 : vector<8x32xf32>
    %133 = arith.mulf %128, %132 : vector<8x32xf32>
    %134 = tpu.concatenate %79, %106 in 1 : vector<8x32xf32>, vector<8x32xf32> -> vector<8x64xf32>
    %135 = arith.truncf %134 : vector<8x64xf32> to vector<8x64xbf16>
    %cst_59 = arith.constant dense<0.000000e+00> : vector<8x128xf32>
    %136 = tpu.matmul %135, %25, %cst_59 {dimension_numbers = #tpu.dot_dimension_numbers<[1], [0], [0], [1], [0, 0, 1, 1], [], []>} : vector<8x64xbf16>, vector<64x128xbf16>, vector<8x128xf32> -> vector<8x128xf32>
    %137 = vector.broadcast %26 : vector<1x128xf32> to vector<8x128xf32>
    %138 = arith.addf %136, %137 : vector<8x128xf32>
    %139 = math.tanh %138 : vector<8x128xf32>
    %140 = vector.extract_strided_slice %139 {offsets = [0, 0], sizes = [8, 32], strides = [1, 1]} : vector<8x128xf32> to vector<8x32xf32>
    %cst_60 = arith.constant 5.000000e-01 : f32
    %141 = vector.broadcast %cst_60 : f32 to vector<8x32xf32>
    %142 = arith.mulf %141, %140 : vector<8x32xf32>
    %cst_61 = arith.constant 5.000000e-01 : f32
    %143 = vector.broadcast %cst_61 : f32 to vector<8x32xf32>
    %144 = arith.addf %143, %142 : vector<8x32xf32>
    %145 = vector.extract_strided_slice %139 {offsets = [0, 32], sizes = [8, 32], strides = [1, 1]} : vector<8x128xf32> to vector<8x32xf32>
    %cst_62 = arith.constant 5.000000e-01 : f32
    %146 = vector.broadcast %cst_62 : f32 to vector<8x32xf32>
    %147 = arith.mulf %146, %145 : vector<8x32xf32>
    %cst_63 = arith.constant 5.000000e-01 : f32
    %148 = vector.broadcast %cst_63 : f32 to vector<8x32xf32>
    %149 = arith.addf %148, %147 : vector<8x32xf32>
    %150 = vector.extract_strided_slice %139 {offsets = [0, 64], sizes = [8, 32], strides = [1, 1]} : vector<8x128xf32> to vector<8x32xf32>
    %151 = vector.extract_strided_slice %139 {offsets = [0, 96], sizes = [8, 32], strides = [1, 1]} : vector<8x128xf32> to vector<8x32xf32>
    %cst_64 = arith.constant 5.000000e-01 : f32
    %152 = vector.broadcast %cst_64 : f32 to vector<8x32xf32>
    %153 = arith.mulf %152, %151 : vector<8x32xf32>
    %cst_65 = arith.constant 5.000000e-01 : f32
    %154 = vector.broadcast %cst_65 : f32 to vector<8x32xf32>
    %155 = arith.addf %154, %153 : vector<8x32xf32>
    %156 = arith.mulf %149, %104 : vector<8x32xf32>
    %157 = arith.mulf %144, %150 : vector<8x32xf32>
    %158 = arith.addf %156, %157 : vector<8x32xf32>
    %159 = math.tanh %158 : vector<8x32xf32>
    %160 = arith.mulf %155, %159 : vector<8x32xf32>
    %c8_66 = arith.constant 8 : index
    %c0_67 = arith.constant 0 : index
    %161 = vector.load %arg14[%c8_66, %c0_67] : memref<64x32xf32, #tpu.memory_space<vmem>>, vector<8x32xf32>
    tpu.vector_store %arg14[%c8_66, %c0_67], %160 {strides = array<i32>} : memref<64x32xf32, #tpu.memory_space<vmem>>, vector<8x32xf32>,
    %c24 = arith.constant 24 : index
    %c0_68 = arith.constant 0 : index
    %162 = vector.load %arg13[%c24, %c0_68] : memref<64x128xf32, #tpu.memory_space<vmem>>, vector<8x128xf32>
    %163 = arith.truncf %133 : vector<8x32xf32> to vector<8x32xbf16>
    %cst_69 = arith.constant dense<0.000000e+00> : vector<8x128xf32>
    %164 = tpu.matmul %163, %18, %cst_69 {dimension_numbers = #tpu.dot_dimension_numbers<[1], [0], [0], [1], [0, 0, 1, 1], [], []>} : vector<8x32xbf16>, vector<32x128xbf16>, vector<8x128xf32> -> vector<8x128xf32>
    %165 = arith.addf %162, %164 : vector<8x128xf32>
    %166 = math.tanh %165 : vector<8x128xf32>
    %167 = vector.extract_strided_slice %166 {offsets = [0, 0], sizes = [8, 32], strides = [1, 1]} : vector<8x128xf32> to vector<8x32xf32>
    %cst_70 = arith.constant 5.000000e-01 : f32
    %168 = vector.broadcast %cst_70 : f32 to vector<8x32xf32>
    %169 = arith.mulf %168, %167 : vector<8x32xf32>
    %cst_71 = arith.constant 5.000000e-01 : f32
    %170 = vector.broadcast %cst_71 : f32 to vector<8x32xf32>
    %171 = arith.addf %170, %169 : vector<8x32xf32>
    %172 = vector.extract_strided_slice %166 {offsets = [0, 32], sizes = [8, 32], strides = [1, 1]} : vector<8x128xf32> to vector<8x32xf32>
    %cst_72 = arith.constant 5.000000e-01 : f32
    %173 = vector.broadcast %cst_72 : f32 to vector<8x32xf32>
    %174 = arith.mulf %173, %172 : vector<8x32xf32>
    %cst_73 = arith.constant 5.000000e-01 : f32
    %175 = vector.broadcast %cst_73 : f32 to vector<8x32xf32>
    %176 = arith.addf %175, %174 : vector<8x32xf32>
    %177 = vector.extract_strided_slice %166 {offsets = [0, 64], sizes = [8, 32], strides = [1, 1]} : vector<8x128xf32> to vector<8x32xf32>
    %178 = vector.extract_strided_slice %166 {offsets = [0, 96], sizes = [8, 32], strides = [1, 1]} : vector<8x128xf32> to vector<8x32xf32>
    %cst_74 = arith.constant 5.000000e-01 : f32
    %179 = vector.broadcast %cst_74 : f32 to vector<8x32xf32>
    %180 = arith.mulf %179, %178 : vector<8x32xf32>
    %cst_75 = arith.constant 5.000000e-01 : f32
    %181 = vector.broadcast %cst_75 : f32 to vector<8x32xf32>
    %182 = arith.addf %181, %180 : vector<8x32xf32>
    %183 = arith.mulf %176, %131 : vector<8x32xf32>
    %184 = arith.mulf %171, %177 : vector<8x32xf32>
    %185 = arith.addf %183, %184 : vector<8x32xf32>
    %186 = math.tanh %185 : vector<8x32xf32>
    %187 = arith.mulf %182, %186 : vector<8x32xf32>
    %188 = tpu.concatenate %133, %160 in 1 : vector<8x32xf32>, vector<8x32xf32> -> vector<8x64xf32>
    %189 = arith.truncf %188 : vector<8x64xf32> to vector<8x64xbf16>
    %cst_76 = arith.constant dense<0.000000e+00> : vector<8x128xf32>
    %190 = tpu.matmul %189, %25, %cst_76 {dimension_numbers = #tpu.dot_dimension_numbers<[1], [0], [0], [1], [0, 0, 1, 1], [], []>} : vector<8x64xbf16>, vector<64x128xbf16>, vector<8x128xf32> -> vector<8x128xf32>
    %191 = vector.broadcast %26 : vector<1x128xf32> to vector<8x128xf32>
    %192 = arith.addf %190, %191 : vector<8x128xf32>
    %193 = math.tanh %192 : vector<8x128xf32>
    %194 = vector.extract_strided_slice %193 {offsets = [0, 0], sizes = [8, 32], strides = [1, 1]} : vector<8x128xf32> to vector<8x32xf32>
    %cst_77 = arith.constant 5.000000e-01 : f32
    %195 = vector.broadcast %cst_77 : f32 to vector<8x32xf32>
    %196 = arith.mulf %195, %194 : vector<8x32xf32>
    %cst_78 = arith.constant 5.000000e-01 : f32
    %197 = vector.broadcast %cst_78 : f32 to vector<8x32xf32>
    %198 = arith.addf %197, %196 : vector<8x32xf32>
    %199 = vector.extract_strided_slice %193 {offsets = [0, 32], sizes = [8, 32], strides = [1, 1]} : vector<8x128xf32> to vector<8x32xf32>
    %cst_79 = arith.constant 5.000000e-01 : f32
    %200 = vector.broadcast %cst_79 : f32 to vector<8x32xf32>
    %201 = arith.mulf %200, %199 : vector<8x32xf32>
    %cst_80 = arith.constant 5.000000e-01 : f32
    %202 = vector.broadcast %cst_80 : f32 to vector<8x32xf32>
    %203 = arith.addf %202, %201 : vector<8x32xf32>
    %204 = vector.extract_strided_slice %193 {offsets = [0, 64], sizes = [8, 32], strides = [1, 1]} : vector<8x128xf32> to vector<8x32xf32>
    %205 = vector.extract_strided_slice %193 {offsets = [0, 96], sizes = [8, 32], strides = [1, 1]} : vector<8x128xf32> to vector<8x32xf32>
    %cst_81 = arith.constant 5.000000e-01 : f32
    %206 = vector.broadcast %cst_81 : f32 to vector<8x32xf32>
    %207 = arith.mulf %206, %205 : vector<8x32xf32>
    %cst_82 = arith.constant 5.000000e-01 : f32
    %208 = vector.broadcast %cst_82 : f32 to vector<8x32xf32>
    %209 = arith.addf %208, %207 : vector<8x32xf32>
    %210 = arith.mulf %203, %158 : vector<8x32xf32>
    %211 = arith.mulf %198, %204 : vector<8x32xf32>
    %212 = arith.addf %210, %211 : vector<8x32xf32>
    %213 = math.tanh %212 : vector<8x32xf32>
    %214 = arith.mulf %209, %213 : vector<8x32xf32>
    %c16_83 = arith.constant 16 : index
    %c0_84 = arith.constant 0 : index
    %215 = vector.load %arg14[%c16_83, %c0_84] : memref<64x32xf32, #tpu.memory_space<vmem>>, vector<8x32xf32>
    tpu.vector_store %arg14[%c16_83, %c0_84], %214 {strides = array<i32>} : memref<64x32xf32, #tpu.memory_space<vmem>>, vector<8x32xf32>,
    %c32 = arith.constant 32 : index
    %c0_85 = arith.constant 0 : index
    %216 = vector.load %arg13[%c32, %c0_85] : memref<64x128xf32, #tpu.memory_space<vmem>>, vector<8x128xf32>
    %217 = arith.truncf %187 : vector<8x32xf32> to vector<8x32xbf16>
    %cst_86 = arith.constant dense<0.000000e+00> : vector<8x128xf32>
    %218 = tpu.matmul %217, %18, %cst_86 {dimension_numbers = #tpu.dot_dimension_numbers<[1], [0], [0], [1], [0, 0, 1, 1], [], []>} : vector<8x32xbf16>, vector<32x128xbf16>, vector<8x128xf32> -> vector<8x128xf32>
    %219 = arith.addf %216, %218 : vector<8x128xf32>
    %220 = math.tanh %219 : vector<8x128xf32>
    %221 = vector.extract_strided_slice %220 {offsets = [0, 0], sizes = [8, 32], strides = [1, 1]} : vector<8x128xf32> to vector<8x32xf32>
    %cst_87 = arith.constant 5.000000e-01 : f32
    %222 = vector.broadcast %cst_87 : f32 to vector<8x32xf32>
    %223 = arith.mulf %222, %221 : vector<8x32xf32>
    %cst_88 = arith.constant 5.000000e-01 : f32
    %224 = vector.broadcast %cst_88 : f32 to vector<8x32xf32>
    %225 = arith.addf %224, %223 : vector<8x32xf32>
    %226 = vector.extract_strided_slice %220 {offsets = [0, 32], sizes = [8, 32], strides = [1, 1]} : vector<8x128xf32> to vector<8x32xf32>
    %cst_89 = arith.constant 5.000000e-01 : f32
    %227 = vector.broadcast %cst_89 : f32 to vector<8x32xf32>
    %228 = arith.mulf %227, %226 : vector<8x32xf32>
    %cst_90 = arith.constant 5.000000e-01 : f32
    %229 = vector.broadcast %cst_90 : f32 to vector<8x32xf32>
    %230 = arith.addf %229, %228 : vector<8x32xf32>
    %231 = vector.extract_strided_slice %220 {offsets = [0, 64], sizes = [8, 32], strides = [1, 1]} : vector<8x128xf32> to vector<8x32xf32>
    %232 = vector.extract_strided_slice %220 {offsets = [0, 96], sizes = [8, 32], strides = [1, 1]} : vector<8x128xf32> to vector<8x32xf32>
    %cst_91 = arith.constant 5.000000e-01 : f32
    %233 = vector.broadcast %cst_91 : f32 to vector<8x32xf32>
    %234 = arith.mulf %233, %232 : vector<8x32xf32>
    %cst_92 = arith.constant 5.000000e-01 : f32
    %235 = vector.broadcast %cst_92 : f32 to vector<8x32xf32>
    %236 = arith.addf %235, %234 : vector<8x32xf32>
    %237 = arith.mulf %230, %185 : vector<8x32xf32>
    %238 = arith.mulf %225, %231 : vector<8x32xf32>
    %239 = arith.addf %237, %238 : vector<8x32xf32>
    %240 = math.tanh %239 : vector<8x32xf32>
    %241 = arith.mulf %236, %240 : vector<8x32xf32>
    %242 = tpu.concatenate %187, %214 in 1 : vector<8x32xf32>, vector<8x32xf32> -> vector<8x64xf32>
    %243 = arith.truncf %242 : vector<8x64xf32> to vector<8x64xbf16>
    %cst_93 = arith.constant dense<0.000000e+00> : vector<8x128xf32>
    %244 = tpu.matmul %243, %25, %cst_93 {dimension_numbers = #tpu.dot_dimension_numbers<[1], [0], [0], [1], [0, 0, 1, 1], [], []>} : vector<8x64xbf16>, vector<64x128xbf16>, vector<8x128xf32> -> vector<8x128xf32>
    %245 = vector.broadcast %26 : vector<1x128xf32> to vector<8x128xf32>
    %246 = arith.addf %244, %245 : vector<8x128xf32>
    %247 = math.tanh %246 : vector<8x128xf32>
    %248 = vector.extract_strided_slice %247 {offsets = [0, 0], sizes = [8, 32], strides = [1, 1]} : vector<8x128xf32> to vector<8x32xf32>
    %cst_94 = arith.constant 5.000000e-01 : f32
    %249 = vector.broadcast %cst_94 : f32 to vector<8x32xf32>
    %250 = arith.mulf %249, %248 : vector<8x32xf32>
    %cst_95 = arith.constant 5.000000e-01 : f32
    %251 = vector.broadcast %cst_95 : f32 to vector<8x32xf32>
    %252 = arith.addf %251, %250 : vector<8x32xf32>
    %253 = vector.extract_strided_slice %247 {offsets = [0, 32], sizes = [8, 32], strides = [1, 1]} : vector<8x128xf32> to vector<8x32xf32>
    %cst_96 = arith.constant 5.000000e-01 : f32
    %254 = vector.broadcast %cst_96 : f32 to vector<8x32xf32>
    %255 = arith.mulf %254, %253 : vector<8x32xf32>
    %cst_97 = arith.constant 5.000000e-01 : f32
    %256 = vector.broadcast %cst_97 : f32 to vector<8x32xf32>
    %257 = arith.addf %256, %255 : vector<8x32xf32>
    %258 = vector.extract_strided_slice %247 {offsets = [0, 64], sizes = [8, 32], strides = [1, 1]} : vector<8x128xf32> to vector<8x32xf32>
    %259 = vector.extract_strided_slice %247 {offsets = [0, 96], sizes = [8, 32], strides = [1, 1]} : vector<8x128xf32> to vector<8x32xf32>
    %cst_98 = arith.constant 5.000000e-01 : f32
    %260 = vector.broadcast %cst_98 : f32 to vector<8x32xf32>
    %261 = arith.mulf %260, %259 : vector<8x32xf32>
    %cst_99 = arith.constant 5.000000e-01 : f32
    %262 = vector.broadcast %cst_99 : f32 to vector<8x32xf32>
    %263 = arith.addf %262, %261 : vector<8x32xf32>
    %264 = arith.mulf %257, %212 : vector<8x32xf32>
    %265 = arith.mulf %252, %258 : vector<8x32xf32>
    %266 = arith.addf %264, %265 : vector<8x32xf32>
    %267 = math.tanh %266 : vector<8x32xf32>
    %268 = arith.mulf %263, %267 : vector<8x32xf32>
    %c24_100 = arith.constant 24 : index
    %c0_101 = arith.constant 0 : index
    %269 = vector.load %arg14[%c24_100, %c0_101] : memref<64x32xf32, #tpu.memory_space<vmem>>, vector<8x32xf32>
    tpu.vector_store %arg14[%c24_100, %c0_101], %268 {strides = array<i32>} : memref<64x32xf32, #tpu.memory_space<vmem>>, vector<8x32xf32>,
    %c40 = arith.constant 40 : index
    %c0_102 = arith.constant 0 : index
    %270 = vector.load %arg13[%c40, %c0_102] : memref<64x128xf32, #tpu.memory_space<vmem>>, vector<8x128xf32>
    %271 = arith.truncf %241 : vector<8x32xf32> to vector<8x32xbf16>
    %cst_103 = arith.constant dense<0.000000e+00> : vector<8x128xf32>
    %272 = tpu.matmul %271, %18, %cst_103 {dimension_numbers = #tpu.dot_dimension_numbers<[1], [0], [0], [1], [0, 0, 1, 1], [], []>} : vector<8x32xbf16>, vector<32x128xbf16>, vector<8x128xf32> -> vector<8x128xf32>
    %273 = arith.addf %270, %272 : vector<8x128xf32>
    %274 = math.tanh %273 : vector<8x128xf32>
    %275 = vector.extract_strided_slice %274 {offsets = [0, 0], sizes = [8, 32], strides = [1, 1]} : vector<8x128xf32> to vector<8x32xf32>
    %cst_104 = arith.constant 5.000000e-01 : f32
    %276 = vector.broadcast %cst_104 : f32 to vector<8x32xf32>
    %277 = arith.mulf %276, %275 : vector<8x32xf32>
    %cst_105 = arith.constant 5.000000e-01 : f32
    %278 = vector.broadcast %cst_105 : f32 to vector<8x32xf32>
    %279 = arith.addf %278, %277 : vector<8x32xf32>
    %280 = vector.extract_strided_slice %274 {offsets = [0, 32], sizes = [8, 32], strides = [1, 1]} : vector<8x128xf32> to vector<8x32xf32>
    %cst_106 = arith.constant 5.000000e-01 : f32
    %281 = vector.broadcast %cst_106 : f32 to vector<8x32xf32>
    %282 = arith.mulf %281, %280 : vector<8x32xf32>
    %cst_107 = arith.constant 5.000000e-01 : f32
    %283 = vector.broadcast %cst_107 : f32 to vector<8x32xf32>
    %284 = arith.addf %283, %282 : vector<8x32xf32>
    %285 = vector.extract_strided_slice %274 {offsets = [0, 64], sizes = [8, 32], strides = [1, 1]} : vector<8x128xf32> to vector<8x32xf32>
    %286 = vector.extract_strided_slice %274 {offsets = [0, 96], sizes = [8, 32], strides = [1, 1]} : vector<8x128xf32> to vector<8x32xf32>
    %cst_108 = arith.constant 5.000000e-01 : f32
    %287 = vector.broadcast %cst_108 : f32 to vector<8x32xf32>
    %288 = arith.mulf %287, %286 : vector<8x32xf32>
    %cst_109 = arith.constant 5.000000e-01 : f32
    %289 = vector.broadcast %cst_109 : f32 to vector<8x32xf32>
    %290 = arith.addf %289, %288 : vector<8x32xf32>
    %291 = arith.mulf %284, %239 : vector<8x32xf32>
    %292 = arith.mulf %279, %285 : vector<8x32xf32>
    %293 = arith.addf %291, %292 : vector<8x32xf32>
    %294 = math.tanh %293 : vector<8x32xf32>
    %295 = arith.mulf %290, %294 : vector<8x32xf32>
    %296 = tpu.concatenate %241, %268 in 1 : vector<8x32xf32>, vector<8x32xf32> -> vector<8x64xf32>
    %297 = arith.truncf %296 : vector<8x64xf32> to vector<8x64xbf16>
    %cst_110 = arith.constant dense<0.000000e+00> : vector<8x128xf32>
    %298 = tpu.matmul %297, %25, %cst_110 {dimension_numbers = #tpu.dot_dimension_numbers<[1], [0], [0], [1], [0, 0, 1, 1], [], []>} : vector<8x64xbf16>, vector<64x128xbf16>, vector<8x128xf32> -> vector<8x128xf32>
    %299 = vector.broadcast %26 : vector<1x128xf32> to vector<8x128xf32>
    %300 = arith.addf %298, %299 : vector<8x128xf32>
    %301 = math.tanh %300 : vector<8x128xf32>
    %302 = vector.extract_strided_slice %301 {offsets = [0, 0], sizes = [8, 32], strides = [1, 1]} : vector<8x128xf32> to vector<8x32xf32>
    %cst_111 = arith.constant 5.000000e-01 : f32
    %303 = vector.broadcast %cst_111 : f32 to vector<8x32xf32>
    %304 = arith.mulf %303, %302 : vector<8x32xf32>
    %cst_112 = arith.constant 5.000000e-01 : f32
    %305 = vector.broadcast %cst_112 : f32 to vector<8x32xf32>
    %306 = arith.addf %305, %304 : vector<8x32xf32>
    %307 = vector.extract_strided_slice %301 {offsets = [0, 32], sizes = [8, 32], strides = [1, 1]} : vector<8x128xf32> to vector<8x32xf32>
    %cst_113 = arith.constant 5.000000e-01 : f32
    %308 = vector.broadcast %cst_113 : f32 to vector<8x32xf32>
    %309 = arith.mulf %308, %307 : vector<8x32xf32>
    %cst_114 = arith.constant 5.000000e-01 : f32
    %310 = vector.broadcast %cst_114 : f32 to vector<8x32xf32>
    %311 = arith.addf %310, %309 : vector<8x32xf32>
    %312 = vector.extract_strided_slice %301 {offsets = [0, 64], sizes = [8, 32], strides = [1, 1]} : vector<8x128xf32> to vector<8x32xf32>
    %313 = vector.extract_strided_slice %301 {offsets = [0, 96], sizes = [8, 32], strides = [1, 1]} : vector<8x128xf32> to vector<8x32xf32>
    %cst_115 = arith.constant 5.000000e-01 : f32
    %314 = vector.broadcast %cst_115 : f32 to vector<8x32xf32>
    %315 = arith.mulf %314, %313 : vector<8x32xf32>
    %cst_116 = arith.constant 5.000000e-01 : f32
    %316 = vector.broadcast %cst_116 : f32 to vector<8x32xf32>
    %317 = arith.addf %316, %315 : vector<8x32xf32>
    %318 = arith.mulf %311, %266 : vector<8x32xf32>
    %319 = arith.mulf %306, %312 : vector<8x32xf32>
    %320 = arith.addf %318, %319 : vector<8x32xf32>
    %321 = math.tanh %320 : vector<8x32xf32>
    %322 = arith.mulf %317, %321 : vector<8x32xf32>
    %c32_117 = arith.constant 32 : index
    %c0_118 = arith.constant 0 : index
    %323 = vector.load %arg14[%c32_117, %c0_118] : memref<64x32xf32, #tpu.memory_space<vmem>>, vector<8x32xf32>
    tpu.vector_store %arg14[%c32_117, %c0_118], %322 {strides = array<i32>} : memref<64x32xf32, #tpu.memory_space<vmem>>, vector<8x32xf32>,
    %c48 = arith.constant 48 : index
    %c0_119 = arith.constant 0 : index
    %324 = vector.load %arg13[%c48, %c0_119] : memref<64x128xf32, #tpu.memory_space<vmem>>, vector<8x128xf32>
    %325 = arith.truncf %295 : vector<8x32xf32> to vector<8x32xbf16>
    %cst_120 = arith.constant dense<0.000000e+00> : vector<8x128xf32>
    %326 = tpu.matmul %325, %18, %cst_120 {dimension_numbers = #tpu.dot_dimension_numbers<[1], [0], [0], [1], [0, 0, 1, 1], [], []>} : vector<8x32xbf16>, vector<32x128xbf16>, vector<8x128xf32> -> vector<8x128xf32>
    %327 = arith.addf %324, %326 : vector<8x128xf32>
    %328 = math.tanh %327 : vector<8x128xf32>
    %329 = vector.extract_strided_slice %328 {offsets = [0, 0], sizes = [8, 32], strides = [1, 1]} : vector<8x128xf32> to vector<8x32xf32>
    %cst_121 = arith.constant 5.000000e-01 : f32
    %330 = vector.broadcast %cst_121 : f32 to vector<8x32xf32>
    %331 = arith.mulf %330, %329 : vector<8x32xf32>
    %cst_122 = arith.constant 5.000000e-01 : f32
    %332 = vector.broadcast %cst_122 : f32 to vector<8x32xf32>
    %333 = arith.addf %332, %331 : vector<8x32xf32>
    %334 = vector.extract_strided_slice %328 {offsets = [0, 32], sizes = [8, 32], strides = [1, 1]} : vector<8x128xf32> to vector<8x32xf32>
    %cst_123 = arith.constant 5.000000e-01 : f32
    %335 = vector.broadcast %cst_123 : f32 to vector<8x32xf32>
    %336 = arith.mulf %335, %334 : vector<8x32xf32>
    %cst_124 = arith.constant 5.000000e-01 : f32
    %337 = vector.broadcast %cst_124 : f32 to vector<8x32xf32>
    %338 = arith.addf %337, %336 : vector<8x32xf32>
    %339 = vector.extract_strided_slice %328 {offsets = [0, 64], sizes = [8, 32], strides = [1, 1]} : vector<8x128xf32> to vector<8x32xf32>
    %340 = vector.extract_strided_slice %328 {offsets = [0, 96], sizes = [8, 32], strides = [1, 1]} : vector<8x128xf32> to vector<8x32xf32>
    %cst_125 = arith.constant 5.000000e-01 : f32
    %341 = vector.broadcast %cst_125 : f32 to vector<8x32xf32>
    %342 = arith.mulf %341, %340 : vector<8x32xf32>
    %cst_126 = arith.constant 5.000000e-01 : f32
    %343 = vector.broadcast %cst_126 : f32 to vector<8x32xf32>
    %344 = arith.addf %343, %342 : vector<8x32xf32>
    %345 = arith.mulf %338, %293 : vector<8x32xf32>
    %346 = arith.mulf %333, %339 : vector<8x32xf32>
    %347 = arith.addf %345, %346 : vector<8x32xf32>
    %348 = math.tanh %347 : vector<8x32xf32>
    %349 = arith.mulf %344, %348 : vector<8x32xf32>
    %350 = tpu.concatenate %295, %322 in 1 : vector<8x32xf32>, vector<8x32xf32> -> vector<8x64xf32>
    %351 = arith.truncf %350 : vector<8x64xf32> to vector<8x64xbf16>
    %cst_127 = arith.constant dense<0.000000e+00> : vector<8x128xf32>
    %352 = tpu.matmul %351, %25, %cst_127 {dimension_numbers = #tpu.dot_dimension_numbers<[1], [0], [0], [1], [0, 0, 1, 1], [], []>} : vector<8x64xbf16>, vector<64x128xbf16>, vector<8x128xf32> -> vector<8x128xf32>
    %353 = vector.broadcast %26 : vector<1x128xf32> to vector<8x128xf32>
    %354 = arith.addf %352, %353 : vector<8x128xf32>
    %355 = math.tanh %354 : vector<8x128xf32>
    %356 = vector.extract_strided_slice %355 {offsets = [0, 0], sizes = [8, 32], strides = [1, 1]} : vector<8x128xf32> to vector<8x32xf32>
    %cst_128 = arith.constant 5.000000e-01 : f32
    %357 = vector.broadcast %cst_128 : f32 to vector<8x32xf32>
    %358 = arith.mulf %357, %356 : vector<8x32xf32>
    %cst_129 = arith.constant 5.000000e-01 : f32
    %359 = vector.broadcast %cst_129 : f32 to vector<8x32xf32>
    %360 = arith.addf %359, %358 : vector<8x32xf32>
    %361 = vector.extract_strided_slice %355 {offsets = [0, 32], sizes = [8, 32], strides = [1, 1]} : vector<8x128xf32> to vector<8x32xf32>
    %cst_130 = arith.constant 5.000000e-01 : f32
    %362 = vector.broadcast %cst_130 : f32 to vector<8x32xf32>
    %363 = arith.mulf %362, %361 : vector<8x32xf32>
    %cst_131 = arith.constant 5.000000e-01 : f32
    %364 = vector.broadcast %cst_131 : f32 to vector<8x32xf32>
    %365 = arith.addf %364, %363 : vector<8x32xf32>
    %366 = vector.extract_strided_slice %355 {offsets = [0, 64], sizes = [8, 32], strides = [1, 1]} : vector<8x128xf32> to vector<8x32xf32>
    %367 = vector.extract_strided_slice %355 {offsets = [0, 96], sizes = [8, 32], strides = [1, 1]} : vector<8x128xf32> to vector<8x32xf32>
    %cst_132 = arith.constant 5.000000e-01 : f32
    %368 = vector.broadcast %cst_132 : f32 to vector<8x32xf32>
    %369 = arith.mulf %368, %367 : vector<8x32xf32>
    %cst_133 = arith.constant 5.000000e-01 : f32
    %370 = vector.broadcast %cst_133 : f32 to vector<8x32xf32>
    %371 = arith.addf %370, %369 : vector<8x32xf32>
    %372 = arith.mulf %365, %320 : vector<8x32xf32>
    %373 = arith.mulf %360, %366 : vector<8x32xf32>
    %374 = arith.addf %372, %373 : vector<8x32xf32>
    %375 = math.tanh %374 : vector<8x32xf32>
    %376 = arith.mulf %371, %375 : vector<8x32xf32>
    %c40_134 = arith.constant 40 : index
    %c0_135 = arith.constant 0 : index
    %377 = vector.load %arg14[%c40_134, %c0_135] : memref<64x32xf32, #tpu.memory_space<vmem>>, vector<8x32xf32>
    tpu.vector_store %arg14[%c40_134, %c0_135], %376 {strides = array<i32>} : memref<64x32xf32, #tpu.memory_space<vmem>>, vector<8x32xf32>,
    %c56 = arith.constant 56 : index
    %c0_136 = arith.constant 0 : index
    %378 = vector.load %arg13[%c56, %c0_136] : memref<64x128xf32, #tpu.memory_space<vmem>>, vector<8x128xf32>
    %379 = arith.truncf %349 : vector<8x32xf32> to vector<8x32xbf16>
    %cst_137 = arith.constant dense<0.000000e+00> : vector<8x128xf32>
    %380 = tpu.matmul %379, %18, %cst_137 {dimension_numbers = #tpu.dot_dimension_numbers<[1], [0], [0], [1], [0, 0, 1, 1], [], []>} : vector<8x32xbf16>, vector<32x128xbf16>, vector<8x128xf32> -> vector<8x128xf32>
    %381 = arith.addf %378, %380 : vector<8x128xf32>
    %382 = math.tanh %381 : vector<8x128xf32>
    %383 = vector.extract_strided_slice %382 {offsets = [0, 0], sizes = [8, 32], strides = [1, 1]} : vector<8x128xf32> to vector<8x32xf32>
    %cst_138 = arith.constant 5.000000e-01 : f32
    %384 = vector.broadcast %cst_138 : f32 to vector<8x32xf32>
    %385 = arith.mulf %384, %383 : vector<8x32xf32>
    %cst_139 = arith.constant 5.000000e-01 : f32
    %386 = vector.broadcast %cst_139 : f32 to vector<8x32xf32>
    %387 = arith.addf %386, %385 : vector<8x32xf32>
    %388 = vector.extract_strided_slice %382 {offsets = [0, 32], sizes = [8, 32], strides = [1, 1]} : vector<8x128xf32> to vector<8x32xf32>
    %cst_140 = arith.constant 5.000000e-01 : f32
    %389 = vector.broadcast %cst_140 : f32 to vector<8x32xf32>
    %390 = arith.mulf %389, %388 : vector<8x32xf32>
    %cst_141 = arith.constant 5.000000e-01 : f32
    %391 = vector.broadcast %cst_141 : f32 to vector<8x32xf32>
    %392 = arith.addf %391, %390 : vector<8x32xf32>
    %393 = vector.extract_strided_slice %382 {offsets = [0, 64], sizes = [8, 32], strides = [1, 1]} : vector<8x128xf32> to vector<8x32xf32>
    %394 = vector.extract_strided_slice %382 {offsets = [0, 96], sizes = [8, 32], strides = [1, 1]} : vector<8x128xf32> to vector<8x32xf32>
    %cst_142 = arith.constant 5.000000e-01 : f32
    %395 = vector.broadcast %cst_142 : f32 to vector<8x32xf32>
    %396 = arith.mulf %395, %394 : vector<8x32xf32>
    %cst_143 = arith.constant 5.000000e-01 : f32
    %397 = vector.broadcast %cst_143 : f32 to vector<8x32xf32>
    %398 = arith.addf %397, %396 : vector<8x32xf32>
    %399 = arith.mulf %392, %347 : vector<8x32xf32>
    %400 = arith.mulf %387, %393 : vector<8x32xf32>
    %401 = arith.addf %399, %400 : vector<8x32xf32>
    %402 = math.tanh %401 : vector<8x32xf32>
    %403 = arith.mulf %398, %402 : vector<8x32xf32>
    %404 = tpu.concatenate %349, %376 in 1 : vector<8x32xf32>, vector<8x32xf32> -> vector<8x64xf32>
    %405 = arith.truncf %404 : vector<8x64xf32> to vector<8x64xbf16>
    %cst_144 = arith.constant dense<0.000000e+00> : vector<8x128xf32>
    %406 = tpu.matmul %405, %25, %cst_144 {dimension_numbers = #tpu.dot_dimension_numbers<[1], [0], [0], [1], [0, 0, 1, 1], [], []>} : vector<8x64xbf16>, vector<64x128xbf16>, vector<8x128xf32> -> vector<8x128xf32>
    %407 = vector.broadcast %26 : vector<1x128xf32> to vector<8x128xf32>
    %408 = arith.addf %406, %407 : vector<8x128xf32>
    %409 = math.tanh %408 : vector<8x128xf32>
    %410 = vector.extract_strided_slice %409 {offsets = [0, 0], sizes = [8, 32], strides = [1, 1]} : vector<8x128xf32> to vector<8x32xf32>
    %cst_145 = arith.constant 5.000000e-01 : f32
    %411 = vector.broadcast %cst_145 : f32 to vector<8x32xf32>
    %412 = arith.mulf %411, %410 : vector<8x32xf32>
    %cst_146 = arith.constant 5.000000e-01 : f32
    %413 = vector.broadcast %cst_146 : f32 to vector<8x32xf32>
    %414 = arith.addf %413, %412 : vector<8x32xf32>
    %415 = vector.extract_strided_slice %409 {offsets = [0, 32], sizes = [8, 32], strides = [1, 1]} : vector<8x128xf32> to vector<8x32xf32>
    %cst_147 = arith.constant 5.000000e-01 : f32
    %416 = vector.broadcast %cst_147 : f32 to vector<8x32xf32>
    %417 = arith.mulf %416, %415 : vector<8x32xf32>
    %cst_148 = arith.constant 5.000000e-01 : f32
    %418 = vector.broadcast %cst_148 : f32 to vector<8x32xf32>
    %419 = arith.addf %418, %417 : vector<8x32xf32>
    %420 = vector.extract_strided_slice %409 {offsets = [0, 64], sizes = [8, 32], strides = [1, 1]} : vector<8x128xf32> to vector<8x32xf32>
    %421 = vector.extract_strided_slice %409 {offsets = [0, 96], sizes = [8, 32], strides = [1, 1]} : vector<8x128xf32> to vector<8x32xf32>
    %cst_149 = arith.constant 5.000000e-01 : f32
    %422 = vector.broadcast %cst_149 : f32 to vector<8x32xf32>
    %423 = arith.mulf %422, %421 : vector<8x32xf32>
    %cst_150 = arith.constant 5.000000e-01 : f32
    %424 = vector.broadcast %cst_150 : f32 to vector<8x32xf32>
    %425 = arith.addf %424, %423 : vector<8x32xf32>
    %426 = arith.mulf %419, %374 : vector<8x32xf32>
    %427 = arith.mulf %414, %420 : vector<8x32xf32>
    %428 = arith.addf %426, %427 : vector<8x32xf32>
    %429 = math.tanh %428 : vector<8x32xf32>
    %430 = arith.mulf %425, %429 : vector<8x32xf32>
    %c48_151 = arith.constant 48 : index
    %c0_152 = arith.constant 0 : index
    %431 = vector.load %arg14[%c48_151, %c0_152] : memref<64x32xf32, #tpu.memory_space<vmem>>, vector<8x32xf32>
    tpu.vector_store %arg14[%c48_151, %c0_152], %430 {strides = array<i32>} : memref<64x32xf32, #tpu.memory_space<vmem>>, vector<8x32xf32>,
    %432 = tpu.concatenate %403, %430 in 1 : vector<8x32xf32>, vector<8x32xf32> -> vector<8x64xf32>
    %433 = arith.truncf %432 : vector<8x64xf32> to vector<8x64xbf16>
    %cst_153 = arith.constant dense<0.000000e+00> : vector<8x128xf32>
    %434 = tpu.matmul %433, %25, %cst_153 {dimension_numbers = #tpu.dot_dimension_numbers<[1], [0], [0], [1], [0, 0, 1, 1], [], []>} : vector<8x64xbf16>, vector<64x128xbf16>, vector<8x128xf32> -> vector<8x128xf32>
    %435 = vector.broadcast %26 : vector<1x128xf32> to vector<8x128xf32>
    %436 = arith.addf %434, %435 : vector<8x128xf32>
    %437 = math.tanh %436 : vector<8x128xf32>
    %438 = vector.extract_strided_slice %437 {offsets = [0, 0], sizes = [8, 32], strides = [1, 1]} : vector<8x128xf32> to vector<8x32xf32>
    %cst_154 = arith.constant 5.000000e-01 : f32
    %439 = vector.broadcast %cst_154 : f32 to vector<8x32xf32>
    %440 = arith.mulf %439, %438 : vector<8x32xf32>
    %cst_155 = arith.constant 5.000000e-01 : f32
    %441 = vector.broadcast %cst_155 : f32 to vector<8x32xf32>
    %442 = arith.addf %441, %440 : vector<8x32xf32>
    %443 = vector.extract_strided_slice %437 {offsets = [0, 32], sizes = [8, 32], strides = [1, 1]} : vector<8x128xf32> to vector<8x32xf32>
    %cst_156 = arith.constant 5.000000e-01 : f32
    %444 = vector.broadcast %cst_156 : f32 to vector<8x32xf32>
    %445 = arith.mulf %444, %443 : vector<8x32xf32>
    %cst_157 = arith.constant 5.000000e-01 : f32
    %446 = vector.broadcast %cst_157 : f32 to vector<8x32xf32>
    %447 = arith.addf %446, %445 : vector<8x32xf32>
    %448 = vector.extract_strided_slice %437 {offsets = [0, 64], sizes = [8, 32], strides = [1, 1]} : vector<8x128xf32> to vector<8x32xf32>
    %449 = vector.extract_strided_slice %437 {offsets = [0, 96], sizes = [8, 32], strides = [1, 1]} : vector<8x128xf32> to vector<8x32xf32>
    %cst_158 = arith.constant 5.000000e-01 : f32
    %450 = vector.broadcast %cst_158 : f32 to vector<8x32xf32>
    %451 = arith.mulf %450, %449 : vector<8x32xf32>
    %cst_159 = arith.constant 5.000000e-01 : f32
    %452 = vector.broadcast %cst_159 : f32 to vector<8x32xf32>
    %453 = arith.addf %452, %451 : vector<8x32xf32>
    %454 = arith.mulf %447, %428 : vector<8x32xf32>
    %455 = arith.mulf %442, %448 : vector<8x32xf32>
    %456 = arith.addf %454, %455 : vector<8x32xf32>
    %457 = math.tanh %456 : vector<8x32xf32>
    %458 = arith.mulf %453, %457 : vector<8x32xf32>
    %c56_160 = arith.constant 56 : index
    %c0_161 = arith.constant 0 : index
    %459 = vector.load %arg14[%c56_160, %c0_161] : memref<64x32xf32, #tpu.memory_space<vmem>>, vector<8x32xf32>
    tpu.vector_store %arg14[%c56_160, %c0_161], %458 {strides = array<i32>} : memref<64x32xf32, #tpu.memory_space<vmem>>, vector<8x32xf32>,
    %c0_162 = arith.constant 0 : index
    %c0_163 = arith.constant 0 : index
    %460 = vector.load %arg14[%c0_162, %c0_163] : memref<64x32xf32, #tpu.memory_space<vmem>>, vector<64x32xf32>
    %461 = arith.truncf %460 : vector<64x32xf32> to vector<64x32xbf16>
    %c0_164 = arith.constant 0 : index
    %c0_165 = arith.constant 0 : index
    %462 = vector.load %arg10[%c0_164, %c0_165] : memref<32x128xbf16, #tpu.memory_space<vmem>>, vector<32x128xbf16>
    %cst_166 = arith.constant dense<0.000000e+00> : vector<64x128xf32>
    %463 = tpu.matmul %461, %462, %cst_166 {dimension_numbers = #tpu.dot_dimension_numbers<[1], [0], [0], [1], [0, 0, 1, 1], [], []>} : vector<64x32xbf16>, vector<32x128xbf16>, vector<64x128xf32> -> vector<64x128xf32>
    %c0_167 = arith.constant 0 : index
    %c0_168 = arith.constant 0 : index
    %464 = vector.load %arg11[%c0_167, %c0_168] : memref<1x128xf32, #tpu.memory_space<vmem>>, vector<1x128xf32>
    %465 = vector.broadcast %464 : vector<1x128xf32> to vector<64x128xf32>
    %466 = arith.addf %463, %465 : vector<64x128xf32>
    %467 = math.tanh %466 : vector<64x128xf32>
    %c0_169 = arith.constant 0 : index
    %c0_170 = arith.constant 0 : index
    %468 = vector.load %arg12[%c0_169, %c0_170] : memref<64x128xf32, #tpu.memory_space<vmem>>, vector<64x128xf32>
    tpu.vector_store %arg12[%c0_169, %c0_170], %467 {strides = array<i32>} : memref<64x128xf32, #tpu.memory_space<vmem>>, vector<64x128xf32>,
    return
  }
}

</mosaic_0001>

<bundles_post_ra>
// kernel: lstm_generator_forward.1
= control target key start
LH: loop header
LB: loop body
LE: loop exit
PB: predicated region body
PF: predicated region fallthrough
CT: control target
= control target key end

     0   :  { %vm77_vm0 = vcmask 1043456   ;;  %vm52_vm1 = vcmask 97280   ;;  %vm2215_vm2 = vmmov 1   ;;  %v2216_v10 = vmov 0.0|0.0   ;;  %s2221_s17 = smov 32   ;;  %s2756_s2 = inlined_call_operand.vmem [shape: f32[12,32], index: 2, kind: input, shape index: {}]   ;;  %s2757_s0 = inlined_call_operand.vmem [shape: f32[64,12], index: 0, kind: input, shape index: {}]   ;;  %s2758_s3 = inlined_call_operand.vmem [shape: f32[20,32], index: 3, kind: input, shape index: {}]   ;;  %s2759_s1 = inlined_call_operand.vmem [shape: f32[8,20], index: 1, kind: input, shape index: {}]   ;;  %s2760_s5 = inlined_call_operand.vmem [shape: bf16[32,128], index: 5, kind: input, shape index: {}]   ;;  %s2761_s6 = inlined_call_operand.vmem [shape: bf16[32,128], index: 6, kind: input, shape index: {}]   ;;  %s2762_s4 = inlined_call_operand.vmem [shape: f32[1,32], index: 4, kind: input, shape index: {}]   ;;  %s2763_s7 = inlined_call_operand.vmem [shape: f32[1,128], index: 7, kind: input, shape index: {}]   ;;  %s2764_s8 = inlined_call_operand.vmem [shape: bf16[64,128], index: 8, kind: input, shape index: {}]   ;;  %s2765_s9 = inlined_call_operand.vmem [shape: f32[1,128], index: 9, kind: input, shape index: {}]   ;;  %s2766_s10 = inlined_call_operand.vmem [shape: bf16[32,128], index: 10, kind: input, shape index: {}]   ;;  %s2767_s11 = inlined_call_operand.vmem [shape: f32[1,128], index: 11, kind: input, shape index: {}]   ;;  %s2768_s12 = inlined_call_operand.vmem [shape: f32[64,128], index: 12, kind: output, shape index: {}]  }
   0x1   :  { %v50_v0 = vld [vmem:[%s2756_s2] sm:$0xff]  ;;  %v51_v1 = vld [vmem:[%s2756_s2 + $0x8] sm:$0xf]  ;;  %vm2108_vm3 = vmpackc.low %vm77_vm0, %vm2215_vm2  ;;  %v2217_v13 = vmov 0.0   ;;  %vm2218_vm4 = vmmov 0   ;;  %vm197_vm5 = vcmask 162816  }
   0x2   :  { %v2107_v2 = vpack.c.bf16 %v51_v1, %v50_v0  ;;  %v46_v3 = vld [vmem:[%s2757_s0 + $0x20] sm:$0xff]  ;;  %v188_v5 = vld [vmem:[%s2758_s3 + $0x8] sm:$0xff]  ;;  %v48_v11 = vld [vmem:[%s2757_s0 + $0x30] sm:$0xff]  ;;  %v2219_v22 = vmov 0   ;;  %vm329_vm6 = vcmask 261120   ;;  %vm606_vm7 = vcmask 523264  }
   0x3   :  { %v187_v4 = vld [vmem:[%s2758_s3] sm:$0xff]  ;;  %1908 = vmatprep.mubr.msk.f32.mxu1 %vm52_vm1, %v46_v3  ;;  %v47_v7 = vld [vmem:[%s2757_s0 + $0x28] sm:$0xff]  ;;  %v44_v12 = vld [vmem:[%s2757_s0 + $0x10] sm:$0xff] }
   0x4   :  { %v42_v6 = vld [vmem:[%s2757_s0] sm:$0xff]  ;;  %2116 = vmatprep.subr.msk.bf16.mxu1 %vm2108_vm3, %v2107_v2  ;;  %2109 = vmatprep.subr.msk.bf16.mxu0 %vm2108_vm3, %v2107_v2  ;;  %v2114_v8 = vpack.c.bf16 %v188_v5, %v187_v4  ;;  %v43_v9 = vld [vmem:[%s2757_s0 + $0x8] sm:$0xff]  ;;  %v49_v14 = vld [vmem:[%s2757_s0 + $0x38] sm:$0xff] }
   0x5   :  { %2117 = vmatpush3.bf16.msk.msra.mxu1 %vm2108_vm3, %v2107_v2  ;;  %2112 = vmatpush3.bf16.msk.msra.mxu0 %vm2108_vm3, %v2107_v2  ;;  %v45_v15 = vld [vmem:[%s2757_s0 + $0x18] sm:$0xff]  ;;  %v189_v16 = vld [vmem:[%s2758_s3 + $0x10] sm:$0xf]  ;;  %v186_v17 = vld [vmem:[%s2759_s1] sm:$0xff] }
   0x6   :  { %2113 = vmatprep.subr.bf16.mxu1 %v2216_v10  ;;  %1902 = vmatprep.mubr.msk.f32.mxu0 %vm52_vm1, %v42_v6  ;;  %v2125_v18 = vld [vmem:[%s2760_s5] sm:$0xff]   ;;  %v2127_v20 = vld [vmem:[%s2760_s5 + $0x8] sm:$0xff]  }
   0x7   :  { %1935 = vmatprep.subr.bf16.mxu0 %v2217_v13  ;;  %v2351_v19 = vld [vmem:[%s2761_s6] sm:$0xff]   ;;  %v2361_v21 = vld [vmem:[%s2761_s6 + $0x8] sm:$0xff]  }
   0x8   :  { %1909 = vmatmul.mubr.msk.f32.vlgmr.msra.gmra.mrb[0].mxu1 %vm52_vm1, %v47_v7  ;;  %1903 = vmatmul.mubr.msk.f32.vlgmr.msra.gmra.mrb[0].mxu0 %vm52_vm1, %v43_v9  ;;  %v1769_v31 = vld [vmem:[%s2762_s4] ss:$0 sm:$0xff] }
   0x9   :  { %2115 = vmatpush3.bf16.msra.mxu1 %v2114_v8  ;;  %1911 = vmatprep.mubr.msk.f32.mxu1 %vm52_vm1, %v48_v11  ;;  %v1772_v3 = vld [vmem:[%s2763_s7] ss:$0 sm:$0xff]  ;;  %s2220_s7 = smov 64  }
   0xa   :  { %1918 = vmatprep.subr.mxu1 %v2217_v13  ;;  %1905 = vmatprep.mubr.msk.f32.mxu0 %vm52_vm1, %v44_v12 }
   0xb   :  { %1936 = vmatpush3.bf16.msra.mxu0 %v2351_v19 }
   0xc   :  { %1912 = vmatmul.mubr.msk.f32.gmra.mrb[2].mxu1 %vm52_vm1, %v49_v14  ;;  %1906 = vmatmul.mubr.msk.f32.gmra.mrb[2].mxu0 %vm52_vm1, %v45_v15 }
   0xd   :  { %1919 = vmatpush3.msk.msra.mxu1 %vm77_vm0, %v189_v16  ;;  %1920 = vmatprep.mubr.msk.f32.mxu1 %vm2218_vm4, %v2217_v13 }
   0xe   :  { %1939 = vmatprep.mubr.msk.bf16.mxu0 %vm2218_vm4, %v2217_v13  ;;  %1923 = vmatprep.subr.bf16.mxu1 %v2125_v18 }
   0xf   :  { %1937 = vmatprep.subr.bf16.mxu0 %v2217_v13 }
  0x10   :  { %1921 = vmatmul.mubr.msk.f32.vlgmr.msra.gmra.mrb[4].mxu1 %vm197_vm5, %v186_v17  ;;  %1938 = vmatpush3.bf16.msra.mxu0 %v2361_v21 }
  0x11   :  { %1924 = vmatpush3.bf16.msra.mxu1 %v2125_v18  ;;  %1943 = vmatprep.subr.bf16.mxu0 %v2217_v13 }
  0x12   :  { %1925 = vmatprep.subr.bf16.mxu1 %v2127_v20 }
  0x13   :  { %1940 = vmatmul.mubr.bf16.vlgmr.msra.gmra.mrb[4].mxu0 %v2219_v22 }
  0x14   :  { %1944 = vmatpush3.bf16.msra.mxu0 %v2351_v19  ;;  %1947 = vmatprep.mubr.msk.bf16.mxu0 %vm2218_vm4, %v2217_v13 }
  0x15   :  { %1926 = vmatpush3.bf16.msra.mxu1 %v2127_v20  ;;  %1945 = vmatprep.subr.bf16.mxu0 %v2217_v13 }
  0x16   :  { %1951 = vmatprep.subr.bf16.mxu1 %v2217_v13 }
  0x18   :  { %1946 = vmatpush3.bf16.msra.mxu0 %v2361_v21 }
  0x19   :  { %1963 = vmatprep.subr.bf16.mxu0 %v2217_v13 }
  0xdb   :  { %v1910_v23 = vpop.f32.mrb[0].mxu1  ;;  %v1904_v24 = vpop.f32.mrb[0].mxu0 }
  0xdc   :  { %v167_v25 = vpop.f32.mrb[1].mxu1  ;;  %v147_v26 = vpop.f32.mrb[1].mxu0 }
  0xdf   :  { %v1913_v27 = vpop.f32.mrb[2].mxu1  ;;  %v1907_v28 = vpop.f32.mrb[2].mxu0 }
  0xe0   :  { %v177_v29 = vpop.f32.mrb[3].mxu1  ;;  %v157_v30 = vpop.f32.mrb[3].mxu0 }
  0xe3   :  { %v270_v32 = vpop.f32.mrb[4].mxu1 }
  0xe4   :  { %v271_v33 = vadd.f32 %v1769_v31, %v270_v32  ;;  %v1922_v34 = vpop.f32.mrb[5].mxu1  ;;  %v2406_v32 = vld [vmem:[%s2764_s8] sm:$0xff]  }
  0xe5   :  { %v2419_v34 = vld [vmem:[%s2764_s8 + $0x10] sm:$0xff]  }
  0xe6   :  { %v277_v35 = vadd.f32 %v1907_v28, %v271_v33  ;;  %v276_v36 = vadd.f32 %v271_v33, %v157_v30  ;;  %v274_v37 = vadd.f32 %v271_v33, %v147_v26  ;;  %v275_v38 = vadd.f32 %v1904_v24, %v271_v33  ;;  %v474_v63 = vpop.f32.mrb[4].mxu0 }
  0xe7   :  { %v278_v39 = vadd.f32 %v271_v33, %v167_v25  ;;  %v279_v40 = vadd.f32 %v1910_v23, %v271_v33  ;;  %v280_v41 = vadd.f32 %v271_v33, %v177_v29  ;;  %v281_v42 = vadd.f32 %v1913_v27, %v271_v33  ;;  %v1941_v0 = vpop.f32.mrb[5].mxu0  ;;  %v2412_v33 = vld [vmem:[%s2764_s8 + $0x8] sm:$0xff]  }
  0xe8   :  { %v285_v43 = vmul.f32 0.2, %v277_v35  ;;  %v284_v44 = vmul.f32 0.2, %v276_v36  ;;  %v282_v45 = vmul.f32 0.2, %v274_v37 }
  0xe9   :  { %v283_v46 = vmul.f32 0.2, %v275_v38  ;;  %v286_v47 = vmul.f32 0.2, %v278_v39  ;;  %v287_v48 = vmul.f32 0.2, %v279_v40 }
  0xea   :  { %v293_v49 = vmax.f32 %v277_v35, %v285_v43  ;;  %v292_v50 = vmax.f32 %v276_v36, %v284_v44  ;;  %v290_v51 = vmax.f32 %v274_v37, %v282_v45  ;;  %v288_v52 = vmul.f32 0.2, %v280_v41  ;;  %v477_v1 = vpop.f32.mrb[6].mxu0  ;;  %v2428_v36 = vld [vmem:[%s2764_s8 + $0x18] sm:$0xff]   ;;  %v2456_v44 = vld [vmem:[%s2765_s9] ss:$0 sm:$0xff] }
  0xeb   :  { %v291_v53 = vmax.f32 %v275_v38, %v283_v46  ;;  %v294_v54 = vmax.f32 %v278_v39, %v286_v47  ;;  %v295_v55 = vmax.f32 %v279_v40, %v287_v48  ;;  %v289_v56 = vmul.f32 0.2, %v281_v42  ;;  %v1942_v2 = vpop.f32.mrb[7].mxu0 }
  0xec   :  { %v308_v57 = vpack.c.bf16 %v293_v49, %v292_v50  ;;  %v296_v58 = vmax.f32 %v280_v41, %v288_v52 }
  0xed   :  { %v307_v59 = vpack.c.bf16 %v291_v53, %v290_v51  ;;  %v309_v60 = vpack.c.bf16 %v295_v55, %v294_v54  ;;  %v297_v61 = vmax.f32 %v281_v42, %v289_v56 }
  0xef   :  { %1927 = vmatprep.mubr.msk.bf16.mxu1 %vm329_vm6, %v307_v59  ;;  %v310_v62 = vpack.c.bf16 %v297_v61, %v296_v58 }
  0xf0   :  { %1928 = vmatmul.mubr.msk.bf16.vlgmr.msra.gmra.mrb[8].mxu1 %vm329_vm6, %v308_v57 }
  0xf1   :  { %1931 = vmatprep.mubr.msk.bf16.mxu1 %vm329_vm6, %v309_v60  ;;  %1952 = vmatpush3.bf16.msra.mxu1 %v2406_v32 }
  0xf2   :  { %1953 = vmatprep.subr.bf16.mxu1 %v2217_v13 }
  0xf5   :  { %1954 = vmatpush3.bf16.msra.mxu1 %v2412_v33 }
  0xf6   :  { %1955 = vmatprep.subr.bf16.mxu1 %v2217_v13 }
  0xf8   :  { %1932 = vmatmul.mubr.msk.bf16.gmra.mrb[12].mxu1 %vm329_vm6, %v310_v62 }
  0xf9   :  { %1959 = vmatprep.mubr.msk.bf16.mxu1 %vm2218_vm4, %v2217_v13  ;;  %1956 = vmatpush3.bf16.msra.mxu1 %v2419_v34 }
  0xfa   :  { %1957 = vmatprep.subr.bf16.mxu1 %v2217_v13 }
  0xfd   :  { %1958 = vmatpush3.bf16.msra.mxu1 %v2428_v36 }
  0xfe   :  { %1971 = vmatprep.subr.bf16.mxu1 %v2217_v13 }
 0x1c3   :  { %v1929_v4 = vpop.f32.mrb[8].mxu1 }
 0x1c4   :  { %v2384_v5 = vadd.f32 %v1929_v4, %v1772_v3  ;;  %v376_v6 = vpop.f32.mrb[9].mxu1 }
 0x1c5   :  { %v377_v7 = vadd.f32 %v1772_v3, %v376_v6  ;;  %v1930_v8 = vpop.f32.mrb[10].mxu1 }
 0x1c6   :  { %v2386_v9 = vadd.f32 %v1930_v8, %v1772_v3  ;;  %v379_v10 = vpop.f32.mrb[11].mxu1 }
 0x1c7   :  { %v480_v11 = vadd.f32 %v474_v63, %v377_v7  ;;  %v2388_v12 = vadd.f32 %v1772_v3, %v379_v10 }
 0x1c9   :  { %2135 = vtanh.f32 %v480_v11 }
 0x1cb   :  { %v1933_v14 = vpop.f32.mrb[12].mxu1 }
 0x1cc   :  { %v2390_v15 = vadd.f32 %v1933_v14, %v1772_v3  ;;  %v392_v16 = vpop.f32.mrb[13].mxu1 }
 0x1cd   :  { %v2392_v17 = vadd.f32 %v1772_v3, %v392_v16  ;;  %v1934_v18 = vpop.f32.mrb[14].mxu1 }
 0x1ce   :  { %v2394_v20 = vadd.f32 %v1934_v18, %v1772_v3  ;;  %v395_v22 = vpop.f32.mrb[15].mxu1 }
 0x1cf   :  { %v2396_v23 = vadd.f32 %v1772_v3, %v395_v22 }
 0x1d3   :  { %v2136_v24 = vpop.eup %2135 }
 0x1d4   :  { %486 = vrot.lane.b32.xlu0 %v2136_v24, %s2220_s7  ;;  %v482_v25 = vmul.f32 0.5, %v2136_v24 }
 0x1d6   :  { %v483_v26 = vadd.f32 0.5, %v482_v25 }
 0x1d8   :  { %v484_v29 = vmul.f32 0.0, %v483_v26 }
 0x246   :  { %v487_v27 = vpop.permute.xlu0 %486 }
 0x247   :  { %v489_v28 = vmul.f32 %v487_v27, %v483_v26 }
 0x249   :  { %491 = vrot.lane.b32.xlu0 %v489_v28, %s2221_s17 }
 0x2bb   :  { %v492_v30 = vpop.permute.xlu0 %491 }
 0x2bc   :  { %v2400_v31 = vadd.f32 %v492_v30, %v484_v29 }
 0x2be   :  { %2137 = vtanh.f32 %v2400_v31 }
 0x2c8   :  { %v2138_v35 = vpop.eup %2137 }
 0x2c9   :  { %497 = vrot.lane.b32.xlu1 %v2138_v35, %s2220_s7 }
 0x33b   :  { %v498_v37 = vpop.permute.xlu1 %497 }
 0x33c   :  { %v500_v38 = vmul.f32 %v498_v37, %v483_v26 }
 0x33e   :  { %v502_v39 = vpack.c.bf16 %v500_v38, %v500_v38  ;;  %571 = vrot.lane.b32.xlu0 %v500_v38, %s2221_s17 }
 0x340   :  { %504 = vrot.lane.b32.xlu1 %v502_v39, %s2221_s17 }
 0x3b0   :  { %v572_v40 = vpop.permute.xlu0 %571 }
 0x3b1   :  { %v574_v41 = vsel %vm329_vm6, %v572_v40, 0.0 }
 0x3b2   :  { %v575_v42 = vpack.c.bf16 %v574_v41, %v574_v41  ;;  %v505_v43 = vpop.permute.xlu1 %504 }
 0x3b3   :  { %1948 = vmatmul.mubr.msk.bf16.vlgmr.msra.gmra.mrb[8].mxu0 %vm329_vm6, %v505_v43 }
 0x3b4   :  { %1960 = vmatmul.mubr.msk.bf16.vlgmr.msra.gmra.mrb[16].mxu1 %vm606_vm7, %v575_v42  ;;  %1964 = vmatpush3.bf16.msra.mxu0 %v2351_v19 }
 0x3b5   :  { %1972 = vmatpush3.bf16.msra.mxu1 %v2406_v32  ;;  %1965 = vmatprep.subr.bf16.mxu0 %v2217_v13 }
 0x3b6   :  { %1973 = vmatprep.subr.bf16.mxu1 %v2217_v13  ;;  %1967 = vmatprep.mubr.msk.bf16.mxu0 %vm2218_vm4, %v2217_v13 }
 0x3b7   :  { %1979 = vmatprep.mubr.msk.bf16.mxu1 %vm2218_vm4, %v2217_v13 }
 0x3b8   :  { %1966 = vmatpush3.bf16.msra.mxu0 %v2361_v21 }
 0x3b9   :  { %1974 = vmatpush3.bf16.msra.mxu1 %v2412_v33  ;;  %1983 = vmatprep.subr.bf16.mxu0 %v2217_v13 }
 0x3ba   :  { %1975 = vmatprep.subr.bf16.mxu1 %v2217_v13 }
 0x3bd   :  { %1976 = vmatpush3.bf16.msra.mxu1 %v2419_v34 }
 0x3be   :  { %1977 = vmatprep.subr.bf16.mxu1 %v2217_v13 }
 0x3c1   :  { %1978 = vmatpush3.bf16.msra.mxu1 %v2428_v36 }
 0x3c2   :  { %2003 = vmatprep.subr.bf16.mxu1 %v2217_v13 }
 0x486   :  { %v543_v45 = vpop.f32.mrb[8].mxu0 }
 0x487   :  { %v549_v46 = vadd.f32 %v543_v45, %v2388_v12  ;;  %v1949_v47 = vpop.f32.mrb[9].mxu0  ;;  %v644_v48 = vpop.f32.mrb[16].mxu1 }
 0x488   :  { %v645_v49 = vadd.f32 %v2456_v44, %v644_v48  ;;  %v546_v50 = vpop.f32.mrb[10].mxu0  ;;  %v1961_v51 = vpop.f32.mrb[17].mxu1 }
 0x489   :  { %2139 = vtanh.f32 %v549_v46  ;;  %v1950_v52 = vpop.f32.mrb[11].mxu0  ;;  %v647_v53 = vpop.f32.mrb[18].mxu1 }
 0x48a   :  { %2141 = vtanh.f32 %v645_v49  ;;  %v1962_v54 = vpop.f32.mrb[19].mxu1 }
 0x493   :  { %v2140_v55 = vpop.eup %2139 }
 0x494   :  { %v2142_v56 = vpop.eup %2141  ;;  %555 = vrot.lane.b32.xlu1 %v2140_v55, %s2220_s7  ;;  %v551_v57 = vmul.f32 0.5, %v2140_v55 }
 0x495   :  { %655 = vrot.lane.b32.xlu0 %v2142_v56, %s2220_s7  ;;  %v651_v58 = vmul.f32 0.5, %v2142_v56 }
 0x496   :  { %v552_v59 = vadd.f32 0.5, %v551_v57 }
 0x497   :  { %v652_v61 = vadd.f32 0.5, %v651_v58 }
 0x498   :  { %v553_v1 = vmul.f32 %v552_v59, %v2400_v31 }
 0x499   :  { %v653_v3 = vmul.f32 0.0, %v652_v61 }
 0x506   :  { %v556_v60 = vpop.permute.xlu1 %555 }
 0x507   :  { %v558_v62 = vmul.f32 %v556_v60, %v552_v59  ;;  %v656_v63 = vpop.permute.xlu0 %655 }
 0x508   :  { %v658_v0 = vmul.f32 %v656_v63, %v652_v61 }
 0x509   :  { %560 = vrot.lane.b32.xlu1 %v558_v62, %s2221_s17 }
 0x50a   :  { %660 = vrot.lane.b32.xlu0 %v658_v0, %s2221_s17 }
 0x57b   :  { %v561_v2 = vpop.permute.xlu1 %560 }
 0x57c   :  { %v563_v4 = vadd.f32 %v561_v2, %v553_v1  ;;  %v661_v6 = vpop.permute.xlu0 %660 }
 0x57d   :  { %v663_v7 = vadd.f32 %v661_v6, %v653_v3 }
 0x57e   :  { %2143 = vtanh.f32 %v563_v4 }
 0x57f   :  { %2145 = vtanh.f32 %v663_v7 }
 0x588   :  { %v2144_v8 = vpop.eup %2143 }
 0x589   :  { %v2146_v10 = vpop.eup %2145  ;;  %566 = vrot.lane.b32.xlu1 %v2144_v8, %s2220_s7 }
 0x58a   :  { %666 = vrot.lane.b32.xlu0 %v2146_v10, %s2220_s7 }
 0x5fb   :  { %v567_v11 = vpop.permute.xlu1 %566 }
 0x5fc   :  { %v569_v12 = vmul.f32 %v567_v11, %v552_v59  ;;  %v667_v16 = vpop.permute.xlu0 %666 }
 0x5fd   :  { %v2469_v18 = vmul.f32 %v667_v16, %v652_v61 }
 0x5fe   :  { %v676_v14 = vpack.c.bf16 %v569_v12, %v569_v12  ;;  %745 = vrot.lane.b32.xlu0 %v569_v12, %s2221_s17 }
 0x600   :  { %678 = vrot.lane.b32.xlu1 %v676_v14, %s2221_s17 }
 0x604   :  { %748 = vrot.lane.b32.xlu1 %v2469_v18, %s2220_s7 }
 0x670   :  { %v746_v24 = vpop.permute.xlu0 %745 }
 0x672   :  { %v679_v22 = vpop.permute.xlu1 %678 }
 0x673   :  { %1968 = vmatmul.mubr.msk.bf16.vlgmr.msra.gmra.mrb[12].mxu0 %vm329_vm6, %v679_v22 }
 0x674   :  { %1984 = vmatpush3.bf16.msra.mxu0 %v2351_v19  ;;  %1987 = vmatprep.mubr.msk.bf16.mxu0 %vm2218_vm4, %v2217_v13 }
 0x675   :  { %1985 = vmatprep.subr.bf16.mxu0 %v2217_v13 }
 0x676   :  { %v749_v25 = vpop.permute.xlu1 %748 }
 0x677   :  { %v751_v26 = vsel %vm329_vm6, %v746_v24, %v749_v25 }
 0x678   :  { %v752_v27 = vpack.c.bf16 %v751_v26, %v751_v26  ;;  %1986 = vmatpush3.bf16.msra.mxu0 %v2361_v21 }
 0x679   :  { %1991 = vmatprep.subr.bf16.mxu0 %v2217_v13 }
 0x67a   :  { %1980 = vmatmul.mubr.msk.bf16.vlgmr.msra.gmra.mrb[20].mxu1 %vm606_vm7, %v752_v27 }
 0x67b   :  { %2004 = vmatpush3.bf16.msra.mxu1 %v2351_v19  ;;  %2007 = vmatprep.mubr.msk.bf16.mxu1 %vm2218_vm4, %v2217_v13 }
 0x67c   :  { %2005 = vmatprep.subr.bf16.mxu1 %v2217_v13 }
 0x67f   :  { %2006 = vmatpush3.bf16.msra.mxu1 %v2361_v21 }
 0x680   :  { %2011 = vmatprep.subr.bf16.mxu1 %v2217_v13 }
 0x746   :  { %v717_v28 = vpop.f32.mrb[12].mxu0 }
 0x747   :  { %v723_v29 = vadd.f32 %v717_v28, %v2384_v5  ;;  %v1969_v30 = vpop.f32.mrb[13].mxu0 }
 0x748   :  { %v720_v31 = vpop.f32.mrb[14].mxu0 }
 0x749   :  { %2147 = vtanh.f32 %v723_v29  ;;  %v1970_v35 = vpop.f32.mrb[15].mxu0 }
 0x74d   :  { %v790_v37 = vpop.f32.mrb[20].mxu1 }
 0x74e   :  { %v791_v38 = vadd.f32 %v2456_v44, %v790_v37  ;;  %v1981_v39 = vpop.f32.mrb[21].mxu1 }
 0x74f   :  { %v793_v40 = vpop.f32.mrb[22].mxu1 }
 0x750   :  { %2149 = vtanh.f32 %v791_v38  ;;  %v1982_v41 = vpop.f32.mrb[23].mxu1 }
 0x753   :  { %v2148_v42 = vpop.eup %2147 }
 0x754   :  { %729 = vrot.lane.b32.xlu0 %v2148_v42, %s2220_s7  ;;  %v725_v45 = vmul.f32 0.5, %v2148_v42 }
 0x756   :  { %v726_v46 = vadd.f32 0.5, %v725_v45 }
 0x758   :  { %v727_v52 = vmul.f32 %v726_v46, %v563_v4 }
 0x75a   :  { %v2150_v43 = vpop.eup %2149 }
 0x75b   :  { %801 = vrot.lane.b32.xlu1 %v2150_v43, %s2220_s7  ;;  %v797_v48 = vmul.f32 0.5, %v2150_v43 }
 0x75d   :  { %v798_v49 = vadd.f32 0.5, %v797_v48 }
 0x75f   :  { %v799_v55 = vmul.f32 %v798_v49, %v663_v7 }
 0x7c6   :  { %v730_v5 = vpop.permute.xlu0 %729 }
 0x7c7   :  { %v732_v47 = vmul.f32 %v730_v5, %v726_v46 }
 0x7c9   :  { %734 = vrot.lane.b32.xlu0 %v732_v47, %s2221_s17 }
 0x7cd   :  { %v802_v50 = vpop.permute.xlu1 %801 }
 0x7ce   :  { %v804_v51 = vmul.f32 %v802_v50, %v798_v49 }
 0x7d0   :  { %806 = vrot.lane.b32.xlu1 %v804_v51, %s2221_s17 }
 0x83b   :  { %v735_v53 = vpop.permute.xlu0 %734 }
 0x83c   :  { %v2494_v54 = vadd.f32 %v735_v53, %v727_v52 }
 0x83e   :  { %2151 = vtanh.f32 %v2494_v54 }
 0x842   :  { %v807_v56 = vpop.permute.xlu1 %806 }
 0x843   :  { %v2497_v57 = vadd.f32 %v807_v56, %v799_v55 }
 0x845   :  { %2153 = vtanh.f32 %v2497_v57 }
 0x848   :  { %v2152_v58 = vpop.eup %2151 }
 0x849   :  { %740 = vrot.lane.b32.xlu0 %v2152_v58, %s2220_s7 }
 0x84f   :  { %v2154_v59 = vpop.eup %2153 }
 0x850   :  { %812 = vrot.lane.b32.xlu1 %v2154_v59, %s2220_s7 }
 0x8bb   :  { %v741_v60 = vpop.permute.xlu0 %740 }
 0x8bc   :  { %v743_v61 = vmul.f32 %v741_v60, %v726_v46 }
 0x8be   :  { %v822_v62 = vpack.c.bf16 %v743_v61, %v743_v61  ;;  %891 = vrot.lane.b32.xlu1 %v743_v61, %s2221_s17 }
 0x8c0   :  { %824 = vrot.lane.b32.xlu0 %v822_v62, %s2221_s17 }
 0x8c2   :  { %v813_v63 = vpop.permute.xlu1 %812 }
 0x8c3   :  { %v2504_v0 = vmul.f32 %v813_v63, %v798_v49 }
 0x8c5   :  { %894 = vrot.lane.b32.xlu0 %v2504_v0, %s2220_s7 }
 0x930   :  { %v892_v3 = vpop.permute.xlu1 %891 }
 0x932   :  { %v825_v1 = vpop.permute.xlu0 %824 }
 0x933   :  { %1988 = vmatmul.mubr.msk.bf16.vlgmr.msra.gmra.mrb[16].mxu0 %vm329_vm6, %v825_v1 }
 0x934   :  { %1992 = vmatpush3.bf16.msra.mxu0 %v2406_v32  ;;  %1999 = vmatprep.mubr.msk.bf16.mxu0 %vm2218_vm4, %v2217_v13 }
 0x935   :  { %1993 = vmatprep.subr.bf16.mxu0 %v2217_v13 }
 0x937   :  { %v895_v2 = vpop.permute.xlu0 %894 }
 0x938   :  { %1994 = vmatpush3.bf16.msra.mxu0 %v2412_v33  ;;  %v897_v4 = vsel %vm329_vm6, %v892_v3, %v895_v2 }
 0x939   :  { %1995 = vmatprep.subr.bf16.mxu0 %v2217_v13  ;;  %v898_v6 = vpack.c.bf16 %v897_v4, %v897_v4 }
 0x93c   :  { %1996 = vmatpush3.bf16.msra.mxu0 %v2419_v34 }
 0x93d   :  { %1997 = vmatprep.subr.bf16.mxu0 %v2217_v13 }
 0x940   :  { %1998 = vmatpush3.bf16.msra.mxu0 %v2428_v36 }
 0x941   :  { %2023 = vmatprep.subr.bf16.mxu0 %v2217_v13 }
 0x943   :  { %2000 = vmatmul.mubr.msk.bf16.vlgmr.msra.gmra.mrb[20].mxu0 %vm606_vm7, %v898_v6 }
 0x944   :  { %2024 = vmatpush3.bf16.msra.mxu0 %v2351_v19  ;;  %2027 = vmatprep.mubr.msk.bf16.mxu0 %vm2218_vm4, %v2217_v13 }
 0x945   :  { %2025 = vmatprep.subr.bf16.mxu0 %v2217_v13 }
 0x948   :  { %2026 = vmatpush3.bf16.msra.mxu0 %v2361_v21 }
 0x949   :  { %2031 = vmatprep.subr.bf16.mxu0 %v2217_v13 }
 0xa06   :  { %v863_v7 = vpop.f32.mrb[16].mxu0 }
 0xa07   :  { %v869_v8 = vadd.f32 %v863_v7, %v2386_v9  ;;  %v1989_v10 = vpop.f32.mrb[17].mxu0 }
 0xa08   :  { %v866_v11 = vpop.f32.mrb[18].mxu0 }
 0xa09   :  { %2155 = vtanh.f32 %v869_v8  ;;  %v1990_v12 = vpop.f32.mrb[19].mxu0 }
 0xa13   :  { %v2156_v14 = vpop.eup %2155 }
 0xa14   :  { %875 = vrot.lane.b32.xlu1 %v2156_v14, %s2220_s7  ;;  %v871_v28 = vmul.f32 0.5, %v2156_v14 }
 0xa16   :  { %v936_v16 = vpop.f32.mrb[20].mxu0  ;;  %v872_v29 = vadd.f32 0.5, %v871_v28 }
 0xa17   :  { %v937_v22 = vadd.f32 %v2456_v44, %v936_v16  ;;  %v2001_v24 = vpop.f32.mrb[21].mxu0 }
 0xa18   :  { %v939_v25 = vpop.f32.mrb[22].mxu0  ;;  %v873_v39 = vmul.f32 %v872_v29, %v2494_v54 }
 0xa19   :  { %2157 = vtanh.f32 %v937_v22  ;;  %v2002_v26 = vpop.f32.mrb[23].mxu0 }
 0xa23   :  { %v2158_v27 = vpop.eup %2157 }
 0xa24   :  { %947 = vrot.lane.b32.xlu0 %v2158_v27, %s2220_s7  ;;  %v943_v31 = vmul.f32 0.5, %v2158_v27 }
 0xa26   :  { %v944_v35 = vadd.f32 0.5, %v943_v31 }
 0xa28   :  { %v945_v43 = vmul.f32 %v944_v35, %v2497_v57 }
 0xa86   :  { %v876_v9 = vpop.permute.xlu1 %875 }
 0xa87   :  { %v878_v30 = vmul.f32 %v876_v9, %v872_v29 }
 0xa89   :  { %880 = vrot.lane.b32.xlu1 %v878_v30, %s2221_s17 }
 0xa96   :  { %v948_v37 = vpop.permute.xlu0 %947 }
 0xa97   :  { %v950_v38 = vmul.f32 %v948_v37, %v944_v35 }
 0xa99   :  { %952 = vrot.lane.b32.xlu0 %v950_v38, %s2221_s17 }
 0xafb   :  { %v881_v40 = vpop.permute.xlu1 %880 }
 0xafc   :  { %v2534_v41 = vadd.f32 %v881_v40, %v873_v39 }
 0xafe   :  { %2159 = vtanh.f32 %v2534_v41 }
 0xb08   :  { %v2160_v42 = vpop.eup %2159 }
 0xb09   :  { %886 = vrot.lane.b32.xlu1 %v2160_v42, %s2220_s7 }
 0xb0b   :  { %v953_v45 = vpop.permute.xlu0 %952 }
 0xb0c   :  { %v2539_v46 = vadd.f32 %v953_v45, %v945_v43 }
 0xb0e   :  { %2161 = vtanh.f32 %v2539_v46 }
 0xb18   :  { %v2162_v5 = vpop.eup %2161 }
 0xb19   :  { %958 = vrot.lane.b32.xlu0 %v2162_v5, %s2220_s7 }
 0xb7b   :  { %v887_v47 = vpop.permute.xlu1 %886 }
 0xb7c   :  { %v889_v48 = vmul.f32 %v887_v47, %v872_v29 }
 0xb7e   :  { %v968_v49 = vpack.c.bf16 %v889_v48, %v889_v48  ;;  %1037 = vrot.lane.b32.xlu0 %v889_v48, %s2221_s17 }
 0xb80   :  { %970 = vrot.lane.b32.xlu1 %v968_v49, %s2221_s17 }
 0xb8b   :  { %v959_v50 = vpop.permute.xlu0 %958 }
 0xb8c   :  { %v2545_v51 = vmul.f32 %v959_v50, %v944_v35 }
 0xb8e   :  { %1040 = vrot.lane.b32.xlu1 %v2545_v51, %s2220_s7 }
 0xbf0   :  { %v1038_v53 = vpop.permute.xlu0 %1037 }
 0xbf2   :  { %v971_v52 = vpop.permute.xlu1 %970 }
 0xbf3   :  { %2008 = vmatmul.mubr.msk.bf16.vlgmr.msra.gmra.mrb[24].mxu1 %vm329_vm6, %v971_v52 }
 0xbf4   :  { %2012 = vmatpush3.bf16.msra.mxu1 %v2406_v32  ;;  %2019 = vmatprep.mubr.msk.bf16.mxu1 %vm2218_vm4, %v2217_v13 }
 0xbf5   :  { %2013 = vmatprep.subr.bf16.mxu1 %v2217_v13 }
 0xbf8   :  { %2014 = vmatpush3.bf16.msra.mxu1 %v2412_v33 }
 0xbf9   :  { %2015 = vmatprep.subr.bf16.mxu1 %v2217_v13 }
 0xbfc   :  { %2016 = vmatpush3.bf16.msra.mxu1 %v2419_v34 }
 0xbfd   :  { %2017 = vmatprep.subr.bf16.mxu1 %v2217_v13 }
 0xc00   :  { %v1041_v54 = vpop.permute.xlu1 %1040  ;;  %2018 = vmatpush3.bf16.msra.mxu1 %v2428_v36 }
 0xc01   :  { %v1043_v55 = vsel %vm329_vm6, %v1038_v53, %v1041_v54  ;;  %2043 = vmatprep.subr.bf16.mxu1 %v2217_v13 }
 0xc02   :  { %v1044_v56 = vpack.c.bf16 %v1043_v55, %v1043_v55 }
 0xc04   :  { %2020 = vmatmul.mubr.msk.bf16.vlgmr.msra.gmra.mrb[28].mxu1 %vm606_vm7, %v1044_v56 }
 0xc05   :  { %2044 = vmatpush3.bf16.msra.mxu1 %v2351_v19  ;;  %2047 = vmatprep.mubr.msk.bf16.mxu1 %vm2218_vm4, %v2217_v13 }
 0xc06   :  { %2045 = vmatprep.subr.bf16.mxu1 %v2217_v13 }
 0xc09   :  { %2046 = vmatpush3.bf16.msra.mxu1 %v2361_v21 }
 0xc0a   :  { %2051 = vmatprep.subr.bf16.mxu1 %v2217_v13 }
 0xcc6   :  { %v1009_v57 = vpop.f32.mrb[24].mxu1 }
 0xcc7   :  { %v1015_v58 = vadd.f32 %v1009_v57, %v2392_v17  ;;  %v2009_v59 = vpop.f32.mrb[25].mxu1 }
 0xcc8   :  { %v1012_v60 = vpop.f32.mrb[26].mxu1 }
 0xcc9   :  { %2163 = vtanh.f32 %v1015_v58  ;;  %v2010_v61 = vpop.f32.mrb[27].mxu1 }
 0xcd3   :  { %v2164_v62 = vpop.eup %2163 }
 0xcd4   :  { %1021 = vrot.lane.b32.xlu0 %v2164_v62, %s2220_s7  ;;  %v1017_v7 = vmul.f32 0.5, %v2164_v62 }
 0xcd6   :  { %v1018_v8 = vadd.f32 0.5, %v1017_v7 }
 0xcd7   :  { %v1082_v63 = vpop.f32.mrb[28].mxu1 }
 0xcd8   :  { %v1083_v1 = vadd.f32 %v2456_v44, %v1082_v63  ;;  %v2021_v2 = vpop.f32.mrb[29].mxu1  ;;  %v1019_v22 = vmul.f32 %v1018_v8, %v2534_v41 }
 0xcd9   :  { %v1085_v3 = vpop.f32.mrb[30].mxu1 }
 0xcda   :  { %2165 = vtanh.f32 %v1083_v1  ;;  %v2022_v4 = vpop.f32.mrb[31].mxu1 }
 0xce4   :  { %v2166_v6 = vpop.eup %2165 }
 0xce5   :  { %1093 = vrot.lane.b32.xlu1 %v2166_v6, %s2220_s7  ;;  %v1089_v11 = vmul.f32 0.5, %v2166_v6 }
 0xce7   :  { %v1090_v12 = vadd.f32 0.5, %v1089_v11 }
 0xce9   :  { %v1091_v27 = vmul.f32 %v1090_v12, %v2539_v46 }
 0xd46   :  { %v1022_v17 = vpop.permute.xlu0 %1021 }
 0xd47   :  { %v1024_v10 = vmul.f32 %v1022_v17, %v1018_v8 }
 0xd49   :  { %1026 = vrot.lane.b32.xlu0 %v1024_v10, %s2221_s17 }
 0xd57   :  { %v1094_v14 = vpop.permute.xlu1 %1093 }
 0xd58   :  { %v1096_v16 = vmul.f32 %v1094_v14, %v1090_v12 }
 0xd5a   :  { %1098 = vrot.lane.b32.xlu1 %v1096_v16, %s2221_s17 }
 0xdbb   :  { %v1027_v24 = vpop.permute.xlu0 %1026 }
 0xdbc   :  { %v2575_v25 = vadd.f32 %v1027_v24, %v1019_v22 }
 0xdbe   :  { %2167 = vtanh.f32 %v2575_v25 }
 0xdc8   :  { %v2168_v26 = vpop.eup %2167 }
 0xdc9   :  { %1032 = vrot.lane.b32.xlu0 %v2168_v26, %s2220_s7 }
 0xdcc   :  { %v1099_v28 = vpop.permute.xlu1 %1098 }
 0xdcd   :  { %v2580_v29 = vadd.f32 %v1099_v28, %v1091_v27 }
 0xdcf   :  { %2169 = vtanh.f32 %v2580_v29 }
 0xdd9   :  { %v2170_v9 = vpop.eup %2169 }
 0xdda   :  { %1104 = vrot.lane.b32.xlu1 %v2170_v9, %s2220_s7 }
 0xe3b   :  { %v1033_v30 = vpop.permute.xlu0 %1032 }
 0xe3c   :  { %v1035_v31 = vmul.f32 %v1033_v30, %v1018_v8 }
 0xe3e   :  { %v1114_v35 = vpack.c.bf16 %v1035_v31, %v1035_v31  ;;  %1183 = vrot.lane.b32.xlu1 %v1035_v31, %s2221_s17 }
 0xe40   :  { %1116 = vrot.lane.b32.xlu0 %v1114_v35, %s2221_s17 }
 0xe4c   :  { %v1105_v37 = vpop.permute.xlu1 %1104 }
 0xe4d   :  { %v2586_v38 = vmul.f32 %v1105_v37, %v1090_v12 }
 0xe4f   :  { %1186 = vrot.lane.b32.xlu0 %v2586_v38, %s2220_s7 }
 0xeb0   :  { %v1184_v40 = vpop.permute.xlu1 %1183 }
 0xeb2   :  { %v1117_v39 = vpop.permute.xlu0 %1116 }
 0xeb3   :  { %2028 = vmatmul.mubr.msk.bf16.vlgmr.msra.gmra.mrb[24].mxu0 %vm329_vm6, %v1117_v39 }
 0xeb4   :  { %2032 = vmatpush3.bf16.msra.mxu0 %v2406_v32  ;;  %2039 = vmatprep.mubr.msk.bf16.mxu0 %vm2218_vm4, %v2217_v13 }
 0xeb5   :  { %2033 = vmatprep.subr.bf16.mxu0 %v2217_v13 }
 0xeb8   :  { %2034 = vmatpush3.bf16.msra.mxu0 %v2412_v33 }
 0xeb9   :  { %2035 = vmatprep.subr.bf16.mxu0 %v2217_v13 }
 0xebc   :  { %2036 = vmatpush3.bf16.msra.mxu0 %v2419_v34 }
 0xebd   :  { %2037 = vmatprep.subr.bf16.mxu0 %v2217_v13 }
 0xec0   :  { %2038 = vmatpush3.bf16.msra.mxu0 %v2428_v36 }
 0xec1   :  { %v1187_v41 = vpop.permute.xlu0 %1186  ;;  %2063 = vmatprep.subr.bf16.mxu0 %v2217_v13 }
 0xec2   :  { %v1189_v42 = vsel %vm329_vm6, %v1184_v40, %v1187_v41 }
 0xec3   :  { %v1190_v43 = vpack.c.bf16 %v1189_v42, %v1189_v42 }
 0xec5   :  { %2040 = vmatmul.mubr.msk.bf16.vlgmr.msra.gmra.mrb[28].mxu0 %vm606_vm7, %v1190_v43 }
 0xec6   :  { %2064 = vmatpush3.bf16.msra.mxu0 %v2351_v19  ;;  %2067 = vmatprep.mubr.msk.bf16.mxu0 %vm2218_vm4, %v2217_v13 }
 0xec7   :  { %2065 = vmatprep.subr.bf16.mxu0 %v2217_v13 }
 0xeca   :  { %2066 = vmatpush3.bf16.msra.mxu0 %v2361_v21 }
 0xecb   :  { %2071 = vmatprep.subr.bf16.mxu0 %v2217_v13 }
 0xf86   :  { %v1155_v45 = vpop.f32.mrb[24].mxu0 }
 0xf87   :  { %v1161_v46 = vadd.f32 %v1155_v45, %v2396_v23  ;;  %v2029_v5 = vpop.f32.mrb[25].mxu0 }
 0xf88   :  { %v1158_v47 = vpop.f32.mrb[26].mxu0 }
 0xf89   :  { %2171 = vtanh.f32 %v1161_v46  ;;  %v2030_v48 = vpop.f32.mrb[27].mxu0 }
 0xf93   :  { %v2172_v49 = vpop.eup %2171 }
 0xf94   :  { %1167 = vrot.lane.b32.xlu1 %v2172_v49, %s2220_s7  ;;  %v1163_v55 = vmul.f32 0.5, %v2172_v49 }
 0xf96   :  { %v1164_v56 = vadd.f32 0.5, %v1163_v55 }
 0xf98   :  { %v1228_v19 = vpop.f32.mrb[28].mxu0  ;;  %v1165_v62 = vmul.f32 %v1164_v56, %v2575_v25 }
 0xf99   :  { %v1229_v50 = vadd.f32 %v2456_v44, %v1228_v19  ;;  %v2041_v52 = vpop.f32.mrb[29].mxu0 }
 0xf9a   :  { %v1231_v53 = vpop.f32.mrb[30].mxu0 }
 0xf9b   :  { %2173 = vtanh.f32 %v1229_v50  ;;  %v2042_v54 = vpop.f32.mrb[31].mxu0 }
 0xfa5   :  { %v2174_v21 = vpop.eup %2173 }
 0xfa6   :  { %1239 = vrot.lane.b32.xlu0 %v2174_v21, %s2220_s7  ;;  %v1235_v58 = vmul.f32 0.5, %v2174_v21 }
 0xfa8   :  { %v1236_v59 = vadd.f32 0.5, %v1235_v58 }
 0xfaa   :  { %v1237_v3 = vmul.f32 %v1236_v59, %v2580_v29 }
0x1006   :  { %v1168_v23 = vpop.permute.xlu1 %1167 }
0x1007   :  { %v1170_v57 = vmul.f32 %v1168_v23, %v1164_v56 }
0x1009   :  { %1172 = vrot.lane.b32.xlu1 %v1170_v57, %s2221_s17 }
0x1018   :  { %v1240_v60 = vpop.permute.xlu0 %1239 }
0x1019   :  { %v1242_v61 = vmul.f32 %v1240_v60, %v1236_v59 }
0x101b   :  { %1244 = vrot.lane.b32.xlu0 %v1242_v61, %s2221_s17 }
0x107b   :  { %v1173_v63 = vpop.permute.xlu1 %1172 }
0x107c   :  { %v2616_v1 = vadd.f32 %v1173_v63, %v1165_v62 }
0x107e   :  { %2175 = vtanh.f32 %v2616_v1 }
0x1088   :  { %v2176_v2 = vpop.eup %2175 }
0x1089   :  { %1178 = vrot.lane.b32.xlu1 %v2176_v2, %s2220_s7 }
0x108d   :  { %v1245_v4 = vpop.permute.xlu0 %1244 }
0x108e   :  { %v2621_v6 = vadd.f32 %v1245_v4, %v1237_v3 }
0x1090   :  { %2177 = vtanh.f32 %v2621_v6 }
0x109a   :  { %v2178_v7 = vpop.eup %2177 }
0x109b   :  { %1250 = vrot.lane.b32.xlu0 %v2178_v7, %s2220_s7 }
0x10fb   :  { %v1179_v8 = vpop.permute.xlu1 %1178 }
0x10fc   :  { %v1181_v17 = vmul.f32 %v1179_v8, %v1164_v56 }
0x10fe   :  { %v1260_v10 = vpack.c.bf16 %v1181_v17, %v1181_v17  ;;  %1329 = vrot.lane.b32.xlu0 %v1181_v17, %s2221_s17 }
0x1100   :  { %1262 = vrot.lane.b32.xlu1 %v1260_v10, %s2221_s17 }
0x110d   :  { %v1251_v11 = vpop.permute.xlu0 %1250 }
0x110e   :  { %v2627_v12 = vmul.f32 %v1251_v11, %v1236_v59 }
0x1110   :  { %1332 = vrot.lane.b32.xlu1 %v2627_v12, %s2220_s7 }
0x1170   :  { %v1330_v16 = vpop.permute.xlu0 %1329 }
0x1172   :  { %v1263_v14 = vpop.permute.xlu1 %1262 }
0x1173   :  { %2048 = vmatmul.mubr.msk.bf16.vlgmr.msra.gmra.mrb[32].mxu1 %vm329_vm6, %v1263_v14 }
0x1174   :  { %2052 = vmatpush3.bf16.msra.mxu1 %v2406_v32  ;;  %2059 = vmatprep.mubr.msk.bf16.mxu1 %vm2218_vm4, %v2217_v13 }
0x1175   :  { %2053 = vmatprep.subr.bf16.mxu1 %v2217_v13 }
0x1178   :  { %2054 = vmatpush3.bf16.msra.mxu1 %v2412_v33 }
0x1179   :  { %2055 = vmatprep.subr.bf16.mxu1 %v2217_v13 }
0x117c   :  { %2056 = vmatpush3.bf16.msra.mxu1 %v2419_v34 }
0x117d   :  { %2057 = vmatprep.subr.bf16.mxu1 %v2217_v13 }
0x1180   :  { %2058 = vmatpush3.bf16.msra.mxu1 %v2428_v36 }
0x1181   :  { %2083 = vmatprep.subr.bf16.mxu1 %v2217_v13 }
0x1182   :  { %v1333_v22 = vpop.permute.xlu1 %1332 }
0x1183   :  { %v1335_v24 = vsel %vm329_vm6, %v1330_v16, %v1333_v22 }
0x1184   :  { %v1336_v25 = vpack.c.bf16 %v1335_v24, %v1335_v24 }
0x1186   :  { %2060 = vmatmul.mubr.msk.bf16.vlgmr.msra.gmra.mrb[36].mxu1 %vm606_vm7, %v1336_v25 }
0x1187   :  { %2084 = vmatpush3.bf16.msra.mxu1 %v2406_v32  ;;  %2091 = vmatprep.mubr.msk.bf16.mxu1 %vm2218_vm4, %v2217_v13 }
0x1188   :  { %2085 = vmatprep.subr.bf16.mxu1 %v2217_v13 }
0x118b   :  { %2086 = vmatpush3.bf16.msra.mxu1 %v2412_v33 }
0x118c   :  { %2087 = vmatprep.subr.bf16.mxu1 %v2217_v13 }
0x118f   :  { %2088 = vmatpush3.bf16.msra.mxu1 %v2419_v34 }
0x1190   :  { %2089 = vmatprep.subr.bf16.mxu1 %v2217_v13 }
0x1193   :  { %2090 = vmatpush3.bf16.msra.mxu1 %v2428_v36 }
0x1246   :  { %v1301_v26 = vpop.f32.mrb[32].mxu1 }
0x1247   :  { %v1307_v27 = vadd.f32 %v1301_v26, %v2390_v15  ;;  %v2049_v28 = vpop.f32.mrb[33].mxu1 }
0x1248   :  { %v1304_v29 = vpop.f32.mrb[34].mxu1 }
0x1249   :  { %2179 = vtanh.f32 %v1307_v27  ;;  %v2050_v9 = vpop.f32.mrb[35].mxu1 }
0x1253   :  { %v2180_v30 = vpop.eup %2179 }
0x1254   :  { %1313 = vrot.lane.b32.xlu0 %v2180_v30, %s2220_s7  ;;  %v1309_v42 = vmul.f32 0.5, %v2180_v30 }
0x1256   :  { %v1310_v43 = vadd.f32 0.5, %v1309_v42 }
0x1258   :  { %v1311_v49 = vmul.f32 %v1310_v43, %v2616_v1 }
0x1259   :  { %v1374_v31 = vpop.f32.mrb[36].mxu1 }
0x125a   :  { %v1375_v35 = vadd.f32 %v2456_v44, %v1374_v31  ;;  %v2061_v37 = vpop.f32.mrb[37].mxu1 }
0x125b   :  { %v1377_v39 = vpop.f32.mrb[38].mxu1 }
0x125c   :  { %2181 = vtanh.f32 %v1375_v35  ;;  %v2062_v40 = vpop.f32.mrb[39].mxu1 }
0x1266   :  { %v2182_v41 = vpop.eup %2181 }
0x1267   :  { %1385 = vrot.lane.b32.xlu1 %v2182_v41, %s2220_s7  ;;  %v1381_v46 = vmul.f32 0.5, %v2182_v41 }
0x1269   :  { %v1382_v5 = vadd.f32 0.5, %v1381_v46 }
0x126b   :  { %v1383_v53 = vmul.f32 %v1382_v5, %v2621_v6 }
0x12c6   :  { %v1314_v15 = vpop.permute.xlu0 %1313 }
0x12c7   :  { %v1316_v45 = vmul.f32 %v1314_v15, %v1310_v43 }
0x12c9   :  { %1318 = vrot.lane.b32.xlu0 %v1316_v45, %s2221_s17 }
0x12d9   :  { %v1386_v47 = vpop.permute.xlu1 %1385 }
0x12da   :  { %v1388_v48 = vmul.f32 %v1386_v47, %v1382_v5 }
0x12dc   :  { %1390 = vrot.lane.b32.xlu1 %v1388_v48, %s2221_s17 }
0x133b   :  { %v1319_v19 = vpop.permute.xlu0 %1318 }
0x133c   :  { %v1321_v50 = vadd.f32 %v1319_v19, %v1311_v49 }
0x133e   :  { %2183 = vtanh.f32 %v1321_v50 }
0x1348   :  { %v2184_v52 = vpop.eup %2183 }
0x1349   :  { %1324 = vrot.lane.b32.xlu0 %v2184_v52, %s2220_s7 }
0x134e   :  { %v1391_v54 = vpop.permute.xlu1 %1390 }
0x134f   :  { %v1393_v21 = vadd.f32 %v1391_v54, %v1383_v53 }
0x1351   :  { %2185 = vtanh.f32 %v1393_v21 }
0x135b   :  { %v2186_v55 = vpop.eup %2185 }
0x135c   :  { %1396 = vrot.lane.b32.xlu1 %v2186_v55, %s2220_s7 }
0x13bb   :  { %v1325_v56 = vpop.permute.xlu0 %1324 }
0x13bc   :  { %v1327_v23 = vmul.f32 %v1325_v56, %v1310_v43 }
0x13be   :  { %v1406_v57 = vpack.c.bf16 %v1327_v23, %v1327_v23  ;;  %1475 = vrot.lane.b32.xlu1 %v1327_v23, %s2221_s17 }
0x13c0   :  { %1408 = vrot.lane.b32.xlu0 %v1406_v57, %s2221_s17 }
0x13ce   :  { %v1397_v58 = vpop.permute.xlu1 %1396 }
0x13cf   :  { %v2665_v59 = vmul.f32 %v1397_v58, %v1382_v5 }
0x13d1   :  { %1478 = vrot.lane.b32.xlu0 %v2665_v59, %s2220_s7 }
0x1430   :  { %v1476_v61 = vpop.permute.xlu1 %1475 }
0x1432   :  { %v1409_v60 = vpop.permute.xlu0 %1408 }
0x1433   :  { %2068 = vmatmul.mubr.msk.bf16.vlgmr.msra.gmra.mrb[32].mxu0 %vm329_vm6, %v1409_v60 }
0x1434   :  { %2072 = vmatpush3.bf16.msra.mxu0 %v2406_v32  ;;  %2079 = vmatprep.mubr.msk.bf16.mxu0 %vm2218_vm4, %v2217_v13 }
0x1435   :  { %2073 = vmatprep.subr.bf16.mxu0 %v2217_v13 }
0x1438   :  { %2074 = vmatpush3.bf16.msra.mxu0 %v2412_v33 }
0x1439   :  { %2075 = vmatprep.subr.bf16.mxu0 %v2217_v13 }
0x143c   :  { %2076 = vmatpush3.bf16.msra.mxu0 %v2419_v34 }
0x143d   :  { %2077 = vmatprep.subr.bf16.mxu0 %v2217_v13 }
0x1440   :  { %2078 = vmatpush3.bf16.msra.mxu0 %v2428_v36 }
0x1443   :  { %v1479_v62 = vpop.permute.xlu0 %1478 }
0x1444   :  { %v1481_v63 = vsel %vm329_vm6, %v1476_v61, %v1479_v62 }
0x1445   :  { %v1482_v32 = vpack.c.bf16 %v1481_v63, %v1481_v63 }
0x1447   :  { %2080 = vmatmul.mubr.msk.bf16.vlgmr.msra.gmra.mrb[36].mxu0 %vm606_vm7, %v1482_v32 }
0x1506   :  { %v1447_v1 = vpop.f32.mrb[32].mxu0 }
0x1507   :  { %v1453_v2 = vadd.f32 %v1447_v1, %v2394_v20  ;;  %v2069_v3 = vpop.f32.mrb[33].mxu0 }
0x1508   :  { %v1450_v33 = vpop.f32.mrb[34].mxu0 }
0x1509   :  { %2187 = vtanh.f32 %v1453_v2  ;;  %v2070_v4 = vpop.f32.mrb[35].mxu0 }
0x1513   :  { %v2188_v6 = vpop.eup %2187 }
0x1514   :  { %1459 = vrot.lane.b32.xlu1 %v2188_v6, %s2220_s7  ;;  %v1455_v10 = vmul.f32 0.5, %v2188_v6 }
0x1516   :  { %v1456_v11 = vadd.f32 0.5, %v1455_v10 }
0x1518   :  { %v1457_v26 = vmul.f32 %v1456_v11, %v1321_v50 }
0x151a   :  { %v1520_v13 = vpop.f32.mrb[36].mxu0 }
0x151b   :  { %v1521_v34 = vadd.f32 %v2456_v44, %v1520_v13  ;;  %v2081_v36 = vpop.f32.mrb[37].mxu0 }
0x151c   :  { %v1523_v7 = vpop.f32.mrb[38].mxu0 }
0x151d   :  { %2189 = vtanh.f32 %v1521_v34  ;;  %v2082_v8 = vpop.f32.mrb[39].mxu0 }
0x151e   :  { %v1801_v8 = vld [vmem:[%s2767_s11] ss:$0 sm:$0xff] }
0x1527   :  { %v2190_v17 = vpop.eup %2189 }
0x1528   :  { %1531 = vrot.lane.b32.xlu0 %v2190_v17, %s2220_s7  ;;  %v1527_v16 = vmul.f32 0.5, %v2190_v17 }
0x152a   :  { %v1528_v22 = vadd.f32 0.5, %v1527_v16 }
0x152c   :  { %v1529_v9 = vmul.f32 %v1528_v22, %v1393_v21 }
0x1586   :  { %v1460_v20 = vpop.permute.xlu1 %1459 }
0x1587   :  { %v1462_v14 = vmul.f32 %v1460_v20, %v1456_v11 }
0x1589   :  { %1464 = vrot.lane.b32.xlu1 %v1462_v14, %s2221_s17 }
0x159a   :  { %v1532_v24 = vpop.permute.xlu0 %1531 }
0x159b   :  { %v1534_v25 = vmul.f32 %v1532_v24, %v1528_v22 }
0x159d   :  { %1536 = vrot.lane.b32.xlu0 %v1534_v25, %s2221_s17 }
0x15fb   :  { %v1465_v27 = vpop.permute.xlu1 %1464 }
0x15fc   :  { %v1467_v28 = vadd.f32 %v1465_v27, %v1457_v26 }
0x15fe   :  { %2191 = vtanh.f32 %v1467_v28 }
0x1608   :  { %v2192_v29 = vpop.eup %2191 }
0x1609   :  { %1470 = vrot.lane.b32.xlu1 %v2192_v29, %s2220_s7 }
0x160f   :  { %v1537_v30 = vpop.permute.xlu0 %1536 }
0x1610   :  { %v1539_v31 = vadd.f32 %v1537_v30, %v1529_v9 }
0x1612   :  { %2193 = vtanh.f32 %v1539_v31 }
0x161c   :  { %v2194_v35 = vpop.eup %2193 }
0x161d   :  { %1542 = vrot.lane.b32.xlu0 %v2194_v35, %s2220_s7 }
0x167b   :  { %v1471_v37 = vpop.permute.xlu1 %1470 }
0x167c   :  { %v1473_v39 = vmul.f32 %v1471_v37, %v1456_v11 }
0x167e   :  { %1552 = vrot.lane.b32.xlu1 %v1473_v39, %s2221_s17 }
0x168f   :  { %v1543_v40 = vpop.permute.xlu0 %1542 }
0x1690   :  { %v1545_v41 = vmul.f32 %v1543_v40, %v1528_v22 }
0x1692   :  { %1555 = vrot.lane.b32.xlu0 %v1545_v41, %s2220_s7 }
0x16f0   :  { %v1553_v42 = vpop.permute.xlu1 %1552 }
0x1704   :  { %v1556_v43 = vpop.permute.xlu0 %1555 }
0x1705   :  { %v1558_v15 = vsel %vm329_vm6, %v1553_v42, %v1556_v43 }
0x1706   :  { %v1559_v45 = vpack.c.bf16 %v1558_v15, %v1558_v15 }
0x1708   :  { %2092 = vmatmul.mubr.msk.bf16.vlgmr.msra.gmra.mrb[40].mxu1 %vm606_vm7, %v1559_v45 }
0x17db   :  { %v1597_v46 = vpop.f32.mrb[40].mxu1 }
0x17dc   :  { %v1598_v5 = vadd.f32 %v2456_v44, %v1597_v46  ;;  %v2093_v47 = vpop.f32.mrb[41].mxu1 }
0x17dd   :  { %v1600_v48 = vpop.f32.mrb[42].mxu1 }
0x17de   :  { %2195 = vtanh.f32 %v1598_v5  ;;  %v2094_v49 = vpop.f32.mrb[43].mxu1 }
0x17e8   :  { %v2196_v19 = vpop.eup %2195 }
0x17e9   :  { %1608 = vrot.lane.b32.xlu1 %v2196_v19, %s2220_s7  ;;  %v1604_v50 = vmul.f32 0.5, %v2196_v19 }
0x17eb   :  { %v1605_v52 = vadd.f32 0.5, %v1604_v50 }
0x17ed   :  { %v1606_v44 = vmul.f32 %v1605_v52, %v1539_v31 }
0x185b   :  { %v1609_v53 = vpop.permute.xlu1 %1608 }
0x185c   :  { %v1611_v54 = vmul.f32 %v1609_v53, %v1605_v52 }
0x185e   :  { %1613 = vrot.lane.b32.xlu0 %v1611_v54, %s2221_s17 }
0x1862   :  { %671 = vrot.lane.b32.xlu0 %v2469_v18, %s2221_s17  ;;  %v2133_v18 = vld [vmem:[%s2766_s10] sm:$0xff]  }
0x1863   :  { %2095 = vmatprep.subr.bf16.mxu0 %v2133_v18 }
0x1864   :  { %2096 = vmatpush3.bf16.msra.mxu0 %v2133_v18 }
0x1866   :  { %963 = vrot.lane.b32.xlu0 %v2545_v51, %s2221_s17 }
0x186a   :  { %1255 = vrot.lane.b32.xlu0 %v2627_v12, %s2221_s17  ;;  %v2134_v12 = vld [vmem:[%s2766_s10 + $0x8] sm:$0xff]  }
0x186b   :  { %2097 = vmatprep.subr.bf16.mxu0 %v2134_v12 }
0x186c   :  { %2098 = vmatpush3.bf16.msra.mxu0 %v2134_v12 }
0x186e   :  { %1547 = vrot.lane.b32.xlu0 %v1545_v41, %s2221_s17 }
0x18d0   :  { %v1614_v21 = vpop.permute.xlu0 %1613 }
0x18d1   :  { %v1616_v55 = vadd.f32 %v1614_v21, %v1606_v44 }
0x18d3   :  { %2197 = vtanh.f32 %v1616_v55 }
0x18d4   :  { %v672_v56 = vpop.permute.xlu0 %671 }
0x18d5   :  { %674 = vst.msk [vmem:[#allocation3] sm:$0xff] %vm329_vm6, %v672_v56 }
0x18d8   :  { %v964_v23 = vpop.permute.xlu0 %963 }
0x18d9   :  { %966 = vst.msk [vmem:[#allocation3 + $0x10] sm:$0xff] %vm329_vm6, %v964_v23 }
0x18dc   :  { %v1256_v51 = vpop.permute.xlu0 %1255  ;;  %v1628_v1 = vld [vmem:[#allocation3] sm:$0xff] }
0x18dd   :  { %v2198_v57 = vpop.eup %2197  ;;  %1258 = vst.msk [vmem:[#allocation3 + $0x20] sm:$0xff] %vm329_vm6, %v1256_v51 }
0x18de   :  { %1619 = vrot.lane.b32.xlu1 %v2198_v57, %s2220_s7 }
0x18e0   :  { %v1548_v58 = vpop.permute.xlu0 %1547 }
0x18e1   :  { %1550 = vst.msk [vmem:[#allocation3 + $0x30] sm:$0xff] %vm329_vm6, %v1548_v58 }
0x18e2   :  { %817 = vrot.lane.b32.xlu1 %v2504_v0, %s2221_s17 }
0x18e4   :  { %v1632_v33 = vld [vmem:[#allocation3 + $0x20] sm:$0xff] }
0x18e6   :  { %1109 = vrot.lane.b32.xlu1 %v2586_v38, %s2221_s17  ;;  %v1630_v38 = vld [vmem:[#allocation3 + $0x10] sm:$0xff] }
0x18e8   :  { %v1634_v34 = vld [vmem:[#allocation3 + $0x30] sm:$0xff] }
0x18ea   :  { %1401 = vrot.lane.b32.xlu1 %v2665_v59, %s2221_s17 }
0x1950   :  { %v1620_v60 = vpop.permute.xlu1 %1619 }
0x1951   :  { %v1622_v61 = vmul.f32 %v1620_v60, %v1605_v52 }
0x1953   :  { %1624 = vrot.lane.b32.xlu1 %v1622_v61, %s2221_s17 }
0x1954   :  { %v818_v62 = vpop.permute.xlu1 %817 }
0x1955   :  { %820 = vst.msk [vmem:[#allocation3 + $0x8] sm:$0xff] %vm329_vm6, %v818_v62 }
0x1958   :  { %v1110_v63 = vpop.permute.xlu1 %1109 }
0x1959   :  { %1112 = vst.msk [vmem:[#allocation3 + $0x18] sm:$0xff] %vm329_vm6, %v1110_v63 }
0x195c   :  { %v1402_v32 = vpop.permute.xlu1 %1401  ;;  %v1629_v2 = vld [vmem:[#allocation3 + $0x8] sm:$0xff] }
0x195d   :  { %1404 = vst.msk [vmem:[#allocation3 + $0x28] sm:$0xff] %vm329_vm6, %v1402_v32  ;;  %v1636_v0 = vpack.c.bf16 %v1629_v2, %v1628_v1 }
0x195f   :  { %2099 = vmatprep.mubr.msk.bf16.mxu0 %vm329_vm6, %v1636_v0 }
0x1960   :  { %v1631_v59 = vld [vmem:[#allocation3 + $0x18] sm:$0xff] }
0x1961   :  { %v1637_v3 = vpack.c.bf16 %v1631_v59, %v1630_v38 }
0x1963   :  { %2100 = vmatmul.mubr.msk.bf16.vlgmr.msra.gmra.mrb[40].mxu0 %vm329_vm6, %v1637_v3 }
0x1964   :  { %v1633_v4 = vld [vmem:[#allocation3 + $0x28] sm:$0xff] }
0x1965   :  { %v1638_v6 = vpack.c.bf16 %v1633_v4, %v1632_v33 }
0x1967   :  { %2103 = vmatprep.mubr.msk.bf16.mxu0 %vm329_vm6, %v1638_v6 }
0x19c5   :  { %v1625_v13 = vpop.permute.xlu1 %1624 }
0x19c6   :  { %1627 = vst.msk [vmem:[#allocation3 + $0x38] sm:$0xff] %vm329_vm6, %v1625_v13 }
0x19cd   :  { %v1635_v36 = vld [vmem:[#allocation3 + $0x38] sm:$0xff] }
0x19ce   :  { %v1639_v7 = vpack.c.bf16 %v1635_v36, %v1634_v34 }
0x19d0   :  { %2104 = vmatmul.mubr.msk.bf16.gmra.mrb[44].mxu0 %vm329_vm6, %v1639_v7 }
0x1a36   :  { %v2101_v17 = vpop.f32.mrb[40].mxu0 }
0x1a37   :  { %v1718_v10 = vadd.f32 %v2101_v17, %v1801_v8  ;;  %v1709_v11 = vpop.f32.mrb[41].mxu0 }
0x1a38   :  { %v1710_v20 = vadd.f32 %v1801_v8, %v1709_v11  ;;  %v2102_v14 = vpop.f32.mrb[42].mxu0 }
0x1a39   :  { %2199 = vtanh.f32 %v1718_v10  ;;  %v1721_v16 = vadd.f32 %v2102_v14, %v1801_v8  ;;  %v1712_v22 = vpop.f32.mrb[43].mxu0 }
0x1a3a   :  { %2201 = vtanh.f32 %v1710_v20  ;;  %v1713_v24 = vadd.f32 %v1801_v8, %v1712_v22 }
0x1a3b   :  { %2203 = vtanh.f32 %v1721_v16 }
0x1a3c   :  { %2205 = vtanh.f32 %v1713_v24 }
0x1a43   :  { %v2200_v25 = vpop.eup %2199 }
0x1a44   :  { %v2202_v26 = vpop.eup %2201  ;;  %1750 = vst [vmem:[%s2768_s12 + $0x10] sm:$0xff] %v2200_v25 }
0x1a45   :  { %v2204_v27 = vpop.eup %2203  ;;  %1748 = vst [vmem:[%s2768_s12] sm:$0xff] %v2202_v26 }
0x1a46   :  { %v2206_v28 = vpop.eup %2205  ;;  %1751 = vst [vmem:[%s2768_s12 + $0x18] sm:$0xff] %v2204_v27 }
0x1a47   :  { %1749 = vst [vmem:[%s2768_s12 + $0x8] sm:$0xff] %v2206_v28 }
0x1aa3   :  { %v2105_v29 = vpop.f32.mrb[44].mxu0 }
0x1aa4   :  { %v1734_v9 = vadd.f32 %v2105_v29, %v1801_v8  ;;  %v1725_v30 = vpop.f32.mrb[45].mxu0 }
0x1aa5   :  { %v1726_v31 = vadd.f32 %v1801_v8, %v1725_v30  ;;  %v2106_v35 = vpop.f32.mrb[46].mxu0 }
0x1aa6   :  { %2207 = vtanh.f32 %v1734_v9  ;;  %v1737_v37 = vadd.f32 %v2106_v35, %v1801_v8  ;;  %v1728_v39 = vpop.f32.mrb[47].mxu0 }
0x1aa7   :  { %2209 = vtanh.f32 %v1726_v31  ;;  %v1729_v40 = vadd.f32 %v1801_v8, %v1728_v39 }
0x1aa8   :  { %2211 = vtanh.f32 %v1737_v37 }
0x1aa9   :  { %2213 = vtanh.f32 %v1729_v40 }
0x1ab0   :  { %v2208_v41 = vpop.eup %2207 }
0x1ab1   :  { %v2210_v42 = vpop.eup %2209  ;;  %1754 = vst [vmem:[%s2768_s12 + $0x30] sm:$0xff] %v2208_v41 }
0x1ab2   :  { %v2212_v43 = vpop.eup %2211  ;;  %1752 = vst [vmem:[%s2768_s12 + $0x20] sm:$0xff] %v2210_v42 }
0x1ab3   :  { %v2214_v15 = vpop.eup %2213  ;;  %1755 = vst [vmem:[%s2768_s12 + $0x38] sm:$0xff] %v2212_v43 }
0x1ab4   :  { %1753 = vst [vmem:[%s2768_s12 + $0x28] sm:$0xff] %v2214_v15 }

</bundles_post_ra>
